<compile_context>
chip_gen: v7x
topology: tpu7x:2x2x1
jax: 0.10.0
libtpu: 0.0.40
codegen_flags: <defaults>
</compile_context>

<pallas_src>
import functools

import jax
import jax.numpy as jnp
from jax import lax
from jax.experimental import pallas as pl
from jax.experimental.pallas import tpu as pltpu


# ----------------------------------------------------------------------------
# Fused kernel (one grid program = one batch block)
# ----------------------------------------------------------------------------
def _api_model_kernel(x2d_ref, freq_ref,
                      wih_c_ref, whh_c_ref, b_c_ref,
                      wih_f_ref, whh_f_ref, b_f_ref,
                      lin_w_ref, lin_b_ref,
                      out_ref,
                      xg_scr, hg_scr,
                      *, C, N, F, BB, BP, H, need_attention):
    """x2d_ref: [C*N, E] class-LSTM input for this batch block, rows ordered
    (c-major, then f, then b) with N = F*BB rows per class timestep.
    freq_ref: [F*BP, 1] frequency weights, row index = f*BP + b (zero-padded).
    Gate columns of all weights/biases are pre-permuted to (i | f | o | g)."""
    f32 = jnp.float32

    # ---- class LSTM: batched input projection (one MXU pass, bias folded) ----
    xg_scr[...] = (jnp.dot(x2d_ref[...], wih_c_ref[...],
                           preferred_element_type=f32)
                   + b_c_ref[...])                                   # [C*N, 4H]

    w_hh_c = whh_c_ref[...]                 # hoist loop-invariant VMEM load
    zeros_c = jnp.zeros((N, H), f32)

    def class_step(t, carry):
        h, c = carry
        off = pl.multiple_of(t * N, N)
        gates = xg_scr[pl.ds(off, N), :] + jnp.dot(
            h, w_hh_c, preferred_element_type=f32)
        ifo = jax.nn.sigmoid(gates[:, :3 * H])     # single contiguous EUP pass
        g_g = jnp.tanh(gates[:, 3 * H:])           # g gate only
        c = ifo[:, H:2 * H] * c + ifo[:, :H] * g_g
        h = ifo[:, 2 * H:3 * H] * jnp.tanh(c)
        return h, c

    h_cls, _ = lax.fori_loop(0, C, class_step, (zeros_c, zeros_c), unroll=True)

    # ---- func LSTM: batched input projection of all F timesteps at once ----
    # h_cls holds class_output[-1] for the F*BB sequences of this batch block.
    hg_rows = (jnp.dot(h_cls, wih_f_ref[...], preferred_element_type=f32)
               + b_f_ref[...])                                       # [F*BB, 4H]
    # One-time scatter into an 8-sublane-padded layout so every per-step read
    # inside the recurrence is an aligned (8,128) tile (pad rows stay zero).
    hg_scr[...] = jnp.zeros_like(hg_scr)
    for f in range(F):
        hg_scr[pl.ds(f * BP, BB), :] = hg_rows[f * BB:(f + 1) * BB, :]

    w_hh_f = whh_f_ref[...]
    zeros_f = jnp.zeros((BP, H), f32)

    def func_step(t, carry):
        h, c, acc = carry
        off = pl.multiple_of(t * BP, BP)
        gates = hg_scr[pl.ds(off, BP), :] + jnp.dot(
            h, w_hh_f, preferred_element_type=f32)
        ifo = jax.nn.sigmoid(gates[:, :3 * H])
        g_g = jnp.tanh(gates[:, 3 * H:])
        c = ifo[:, H:2 * H] * c + ifo[:, :H] * g_g
        h = ifo[:, 2 * H:3 * H] * jnp.tanh(c)
        # Fused freq-weighting + mean-pool accumulation (VPU filler work).
        if need_attention == 1:
            acc = acc + freq_ref[pl.ds(off, BP), :] * h
        else:
            acc = acc + h
        return h, c, acc

    _, _, acc = lax.fori_loop(0, F, func_step,
                              (zeros_f, zeros_f, zeros_f), unroll=True)

    # ---- avg pool, tanh, linear head ----
    enc = jnp.tanh(acc * jnp.float32(1.0 / F))
    out_ref[...] = (jnp.dot(enc, lin_w_ref[...], preferred_element_type=f32)
                    + lin_b_ref[...])


# ----------------------------------------------------------------------------
# Wrapper
# ----------------------------------------------------------------------------
def _perm_gate_cols(w, H):
    """Reorder gate column blocks (i|f|g|o) -> (i|f|o|g)."""
    return jnp.concatenate([w[:, :2 * H], w[:, 3 * H:4 * H], w[:, 2 * H:3 * H]],
                           axis=1)


def api_model_forward(params, api_seq, freq_input, need_attention=1):
    """api_seq: [B, F, C] int32 token ids; freq_input: [B, F] float.
    Returns encoding [B, emb_dim] (matches ApiModel.forward, eval mode)."""
    f32 = jnp.float32
    B, F_len, C_len = api_seq.shape
    E = params["center_vec"].shape[1]
    H = params["class_w_hh"].shape[1]
    E_out = params["lin_w"].shape[0]

    # Batch blocking: one grid program per block of `bb` batch rows (parallel
    # across TensorCores); func-side state padded to BP=8 sublanes.
    bb = B if B <= 8 else 8
    G = -(-B // bb)
    Bpad = G * bb
    BP = 8
    N = F_len * bb                      # class-LSTM rows per timestep per block

    if Bpad != B:
        api_seq_p = jnp.concatenate(
            [api_seq, jnp.zeros((Bpad - B, F_len, C_len), api_seq.dtype)], 0)
        freq_in_p = jnp.concatenate(
            [freq_input, jnp.zeros((Bpad - B, F_len), freq_input.dtype)], 0)
    else:
        api_seq_p, freq_in_p = api_seq, freq_input

    # Per-block c-major / f-major / b-minor row layout of the embedded input.
    # TODO(synk): at realistic vocab sizes, fuse this gather into the kernel
    # via scalar-prefetched indices instead of a plain-JAX gather.
    idx = jnp.transpose(api_seq_p.reshape(G, bb, F_len, C_len),
                        (0, 3, 2, 1))                               # [G, C, F, bb]
    x2d = params["center_vec"][idx].astype(f32).reshape(G * C_len * N, E)

    freq_t = jnp.transpose(freq_in_p.astype(f32).reshape(G, bb, F_len),
                           (0, 2, 1))                               # [G, F, bb]
    freq_pad = jnp.zeros((G, F_len, BP), f32).at[:, :, :bb].set(freq_t)
    freq2d = freq_pad.reshape(G * F_len * BP, 1)

    # Weights: transpose for x @ W, fold biases, permute gates to (i|f|o|g).
    wih_c = _perm_gate_cols(params["class_w_ih"].astype(f32).T, H)   # [E, 4H]
    whh_c = _perm_gate_cols(params["class_w_hh"].astype(f32).T, H)   # [H, 4H]
    b_c = _perm_gate_cols((params["class_b_ih"] + params["class_b_hh"]
                           ).astype(f32).reshape(1, 4 * H), H)
    wih_f = _perm_gate_cols(params["func_w_ih"].astype(f32).T, H)    # [H, 4H]
    whh_f = _perm_gate_cols(params["func_w_hh"].astype(f32).T, H)    # [H, 4H]
    b_f = _perm_gate_cols((params["func_b_ih"] + params["func_b_hh"]
                           ).astype(f32).reshape(1, 4 * H), H)
    lin_w = params["lin_w"].astype(f32).T                            # [H, E_out]
    lin_b = params["lin_b"].astype(f32).reshape(1, E_out)

    kernel = functools.partial(_api_model_kernel, C=C_len, N=N, F=F_len,
                               BB=bb, BP=BP, H=H,
                               need_attention=int(need_attention))

    out_pad = pl.pallas_call(
        kernel,
        out_shape=jax.ShapeDtypeStruct((G * BP, E_out), f32),
        grid=(G,),
        in_specs=[
            pl.BlockSpec((C_len * N, E), lambda g: (g, 0)),
            pl.BlockSpec((F_len * BP, 1), lambda g: (g, 0)),
            pl.BlockSpec((E, 4 * H), lambda g: (0, 0)),
            pl.BlockSpec((H, 4 * H), lambda g: (0, 0)),
            pl.BlockSpec((1, 4 * H), lambda g: (0, 0)),
            pl.BlockSpec((H, 4 * H), lambda g: (0, 0)),
            pl.BlockSpec((H, 4 * H), lambda g: (0, 0)),
            pl.BlockSpec((1, 4 * H), lambda g: (0, 0)),
            pl.BlockSpec((H, E_out), lambda g: (0, 0)),
            pl.BlockSpec((1, E_out), lambda g: (0, 0)),
        ],
        out_specs=pl.BlockSpec((BP, E_out), lambda g: (g, 0)),
        scratch_shapes=[
            pltpu.VMEM((C_len * N, 4 * H), f32),   # class input-proj gates
            pltpu.VMEM((F_len * BP, 4 * H), f32),  # func input-proj gates (padded)
        ],
        compiler_params=pltpu.CompilerParams(
            dimension_semantics=("parallel",),
            vmem_limit_bytes=32 * 1024 * 1024),
    )(x2d, freq2d, wih_c, whh_c, b_c, wih_f, whh_f, b_f, lin_w, lin_b)

    out = out_pad.reshape(G, BP, E_out)[:, :bb, :].reshape(G * bb, E_out)
    return out[:B]


# ----------------------------------------------------------------------------
# Pure-JAX reference (PyTorch semantics) for correctness only
# ----------------------------------------------------------------------------
def _lstm_ref(x, w_ih, w_hh, b_ih, b_hh):
    T, Nn, D = x.shape
    H = w_hh.shape[1]

    def cell(carry, x_t):
        h, c = carry
        g = x_t @ w_ih.T + h @ w_hh.T + b_ih + b_hh
        i = jax.nn.sigmoid(g[:, 0 * H:1 * H])
        f = jax.nn.sigmoid(g[:, 1 * H:2 * H])
        gg = jnp.tanh(g[:, 2 * H:3 * H])
        o = jax.nn.sigmoid(g[:, 3 * H:4 * H])
        c = f * c + i * gg
        h = o * jnp.tanh(c)
        return (h, c), h

    init = (jnp.zeros((Nn, H)), jnp.zeros((Nn, H)))
    _, hs = lax.scan(cell, init, x)
    return hs


def _reference_forward(params, api_seq, freq_input, need_attention):
    B, F_len, C_len = api_seq.shape
    H = params["class_w_hh"].shape[1]
    emb = params["center_vec"][api_seq.reshape(-1, C_len)]            # [B*F, C, E]
    co = _lstm_ref(jnp.transpose(emb, (1, 0, 2)), params["class_w_ih"],
                   params["class_w_hh"], params["class_b_ih"], params["class_b_hh"])
    fi = co[-1].reshape(B, F_len, H)
    fo = _lstm_ref(jnp.transpose(fi, (1, 0, 2)), params["func_w_ih"],
                   params["func_w_hh"], params["func_b_ih"], params["func_b_hh"])
    fo = jnp.transpose(fo, (1, 0, 2))                                  # [B, F, H]
    if need_attention == 1:
        fo = fo * freq_input[:, :, None]
    enc = jnp.tanh(jnp.mean(fo, axis=1))
    return enc @ params["lin_w"].T + params["lin_b"]                   # [B, E]


# ----------------------------------------------------------------------------
# Main
# ----------------------------------------------------------------------------
if __name__ == "__main__":
    emb_dim = 32
    hidden = 32
    vocab = 16
    B, func_len, class_len = 2, 4, 8
    need_attention = 1

    key = jax.random.PRNGKey(0)
    ks = jax.random.split(key, 12)

    params = {
        "center_vec": jax.random.normal(ks[0], (vocab, emb_dim), jnp.float32) * 0.1,
        "class_w_ih": jax.random.normal(ks[1], (4 * hidden, emb_dim), jnp.float32) * 0.1,
        "class_w_hh": jax.random.normal(ks[2], (4 * hidden, hidden), jnp.float32) * 0.1,
        "class_b_ih": jax.random.normal(ks[3], (4 * hidden,), jnp.float32) * 0.1,
        "class_b_hh": jax.random.normal(ks[4], (4 * hidden,), jnp.float32) * 0.1,
        "func_w_ih": jax.random.normal(ks[5], (4 * hidden, hidden), jnp.float32) * 0.1,
        "func_w_hh": jax.random.normal(ks[6], (4 * hidden, hidden), jnp.float32) * 0.1,
        "func_b_ih": jax.random.normal(ks[7], (4 * hidden,), jnp.float32) * 0.1,
        "func_b_hh": jax.random.normal(ks[8], (4 * hidden,), jnp.float32) * 0.1,
        "lin_w": jax.random.normal(ks[9], (emb_dim, hidden), jnp.float32) * 0.1,
        "lin_b": jax.random.normal(ks[10], (emb_dim,), jnp.float32) * 0.1,
    }

    dk = jax.random.split(jax.random.PRNGKey(0), 2)
    api_seq = jax.random.randint(dk[0], (B, func_len, class_len), 0, vocab, jnp.int32)
    freq_input = jax.random.uniform(dk[1], (B, func_len), jnp.float32)

    encoding = api_model_forward(params, api_seq, freq_input, need_attention)
    encoding = jax.block_until_ready(encoding)

    ref = _reference_forward(params, api_seq, freq_input, need_attention)
    assert encoding.shape == (B, emb_dim)
    assert jnp.allclose(encoding, ref, atol=1e-4, rtol=1e-4), "mismatch vs reference"

    print("KERNEL_OK")
</pallas_src>

<mosaic_0001>
module attributes {stable_mosaic.version = 11 : i64} {
  func.func @_api_model_kernel(%arg0: i32, %arg1: memref<64x32xf32, #tpu.memory_space<vmem>>, %arg2: memref<32x1xf32, #tpu.memory_space<vmem>>, %arg3: memref<32x128xf32, #tpu.memory_space<vmem>>, %arg4: memref<32x128xf32, #tpu.memory_space<vmem>>, %arg5: memref<1x128xf32, #tpu.memory_space<vmem>>, %arg6: memref<32x128xf32, #tpu.memory_space<vmem>>, %arg7: memref<32x128xf32, #tpu.memory_space<vmem>>, %arg8: memref<1x128xf32, #tpu.memory_space<vmem>>, %arg9: memref<32x32xf32, #tpu.memory_space<vmem>>, %arg10: memref<1x32xf32, #tpu.memory_space<vmem>>, %arg11: memref<8x32xf32, #tpu.memory_space<vmem>>, %arg12: memref<64x128xf32, #tpu.memory_space<vmem>>, %arg13: memref<32x128xf32, #tpu.memory_space<vmem>>) attributes {dimension_semantics = [#tpu.dimension_semantics<parallel>], iteration_bounds = array<i64: 1>, scalar_prefetch = 0 : i64, scratch_operands = 2 : i64, tpu.core_type = #tpu.core_type<tc>, window_params = [{transform_indices = @transform_0, window_bounds = array<i64: 64, 32>}, {transform_indices = @transform_1, window_bounds = array<i64: 32, 1>}, {pipeline_mode = #tpu.pipeline_mode<synchronous>, transform_indices = @transform_2, window_bounds = array<i64: 32, 128>}, {pipeline_mode = #tpu.pipeline_mode<synchronous>, transform_indices = @transform_3, window_bounds = array<i64: 32, 128>}, {pipeline_mode = #tpu.pipeline_mode<synchronous>, transform_indices = @transform_4, window_bounds = array<i64: 1, 128>}, {pipeline_mode = #tpu.pipeline_mode<synchronous>, transform_indices = @transform_5, window_bounds = array<i64: 32, 128>}, {pipeline_mode = #tpu.pipeline_mode<synchronous>, transform_indices = @transform_6, window_bounds = array<i64: 32, 128>}, {pipeline_mode = #tpu.pipeline_mode<synchronous>, transform_indices = @transform_7, window_bounds = array<i64: 1, 128>}, {pipeline_mode = #tpu.pipeline_mode<synchronous>, transform_indices = @transform_8, window_bounds = array<i64: 32, 32>}, {pipeline_mode = #tpu.pipeline_mode<synchronous>, transform_indices = @transform_9, window_bounds = array<i64: 1, 32>}, {transform_indices = @transform_10, window_bounds = array<i64: 8, 32>}]} {
    %c0 = arith.constant 0 : index
    %c0_0 = arith.constant 0 : index
    %0 = vector.load %arg1[%c0, %c0_0] : memref<64x32xf32, #tpu.memory_space<vmem>>, vector<64x32xf32>
    %c0_1 = arith.constant 0 : index
    %c0_2 = arith.constant 0 : index
    %1 = vector.load %arg3[%c0_1, %c0_2] : memref<32x128xf32, #tpu.memory_space<vmem>>, vector<32x128xf32>
    %cst = arith.constant dense<0.000000e+00> : vector<64x128xf32>
    %2 = tpu.matmul %0, %1, %cst {dimension_numbers = #tpu.dot_dimension_numbers<[1], [0], [0], [1], [0, 0, 1, 1], [], []>} : vector<64x32xf32>, vector<32x128xf32>, vector<64x128xf32> -> vector<64x128xf32>
    %c0_3 = arith.constant 0 : index
    %c0_4 = arith.constant 0 : index
    %3 = vector.load %arg5[%c0_3, %c0_4] : memref<1x128xf32, #tpu.memory_space<vmem>>, vector<1x128xf32>
    %4 = vector.broadcast %3 : vector<1x128xf32> to vector<64x128xf32>
    %5 = arith.addf %2, %4 : vector<64x128xf32>
    %c0_5 = arith.constant 0 : index
    %c0_6 = arith.constant 0 : index
    %6 = vector.load %arg12[%c0_5, %c0_6] : memref<64x128xf32, #tpu.memory_space<vmem>>, vector<64x128xf32>
    tpu.vector_store %arg12[%c0_5, %c0_6], %5 {strides = array<i32>} : memref<64x128xf32, #tpu.memory_space<vmem>>, vector<64x128xf32>,
    %c0_7 = arith.constant 0 : index
    %c0_8 = arith.constant 0 : index
    %7 = vector.load %arg4[%c0_7, %c0_8] : memref<32x128xf32, #tpu.memory_space<vmem>>, vector<32x128xf32>
    %cst_9 = arith.constant 0.000000e+00 : f32
    %8 = vector.broadcast %cst_9 : f32 to vector<8x32xf32>
    %c0_i32 = arith.constant 0 : i32
    %c8_i32 = arith.constant 8 : i32
    %9 = arith.muli %c0_i32, %c8_i32 : i32
    %10 = tpu.assume_multiple %9, 8 : i32
    %11 = arith.index_cast %10 : i32 to index
    %c0_10 = arith.constant 0 : index
    %12 = vector.load %arg12[%11, %c0_10] : memref<64x128xf32, #tpu.memory_space<vmem>>, vector<8x128xf32>
    %cst_11 = arith.constant dense<0.000000e+00> : vector<8x128xf32>
    %13 = tpu.matmul %8, %7, %cst_11 {dimension_numbers = #tpu.dot_dimension_numbers<[1], [0], [0], [1], [0, 0, 1, 1], [], []>} : vector<8x32xf32>, vector<32x128xf32>, vector<8x128xf32> -> vector<8x128xf32>
    %14 = arith.addf %12, %13 : vector<8x128xf32>
    %15 = vector.extract_strided_slice %14 {offsets = [0, 0], sizes = [8, 96], strides = [1, 1]} : vector<8x128xf32> to vector<8x96xf32>
    %16 = arith.negf %15 : vector<8x96xf32>
    %17 = math.exp %16 : vector<8x96xf32>
    %cst_12 = arith.constant 1.000000e+00 : f32
    %18 = vector.broadcast %cst_12 : f32 to vector<8x96xf32>
    %19 = arith.addf %18, %17 : vector<8x96xf32>
    %20 = arith.divf %18, %19 : vector<8x96xf32>
    %21 = vector.extract_strided_slice %14 {offsets = [0, 96], sizes = [8, 32], strides = [1, 1]} : vector<8x128xf32> to vector<8x32xf32>
    %22 = math.tanh %21 : vector<8x32xf32>
    %23 = vector.extract_strided_slice %20 {offsets = [0, 32], sizes = [8, 32], strides = [1, 1]} : vector<8x96xf32> to vector<8x32xf32>
    %24 = arith.mulf %23, %8 : vector<8x32xf32>
    %25 = vector.extract_strided_slice %20 {offsets = [0, 0], sizes = [8, 32], strides = [1, 1]} : vector<8x96xf32> to vector<8x32xf32>
    %26 = arith.mulf %25, %22 : vector<8x32xf32>
    %27 = arith.addf %24, %26 : vector<8x32xf32>
    %28 = vector.extract_strided_slice %20 {offsets = [0, 64], sizes = [8, 32], strides = [1, 1]} : vector<8x96xf32> to vector<8x32xf32>
    %29 = math.tanh %27 : vector<8x32xf32>
    %30 = arith.mulf %28, %29 : vector<8x32xf32>
    %c1_i32 = arith.constant 1 : i32
    %c8_i32_13 = arith.constant 8 : i32
    %31 = arith.muli %c1_i32, %c8_i32_13 : i32
    %32 = tpu.assume_multiple %31, 8 : i32
    %33 = arith.index_cast %32 : i32 to index
    %c0_14 = arith.constant 0 : index
    %34 = vector.load %arg12[%33, %c0_14] : memref<64x128xf32, #tpu.memory_space<vmem>>, vector<8x128xf32>
    %cst_15 = arith.constant dense<0.000000e+00> : vector<8x128xf32>
    %35 = tpu.matmul %30, %7, %cst_15 {dimension_numbers = #tpu.dot_dimension_numbers<[1], [0], [0], [1], [0, 0, 1, 1], [], []>} : vector<8x32xf32>, vector<32x128xf32>, vector<8x128xf32> -> vector<8x128xf32>
    %36 = arith.addf %34, %35 : vector<8x128xf32>
    %37 = vector.extract_strided_slice %36 {offsets = [0, 0], sizes = [8, 96], strides = [1, 1]} : vector<8x128xf32> to vector<8x96xf32>
    %38 = arith.negf %37 : vector<8x96xf32>
    %39 = math.exp %38 : vector<8x96xf32>
    %cst_16 = arith.constant 1.000000e+00 : f32
    %40 = vector.broadcast %cst_16 : f32 to vector<8x96xf32>
    %41 = arith.addf %40, %39 : vector<8x96xf32>
    %42 = arith.divf %40, %41 : vector<8x96xf32>
    %43 = vector.extract_strided_slice %36 {offsets = [0, 96], sizes = [8, 32], strides = [1, 1]} : vector<8x128xf32> to vector<8x32xf32>
    %44 = math.tanh %43 : vector<8x32xf32>
    %45 = vector.extract_strided_slice %42 {offsets = [0, 32], sizes = [8, 32], strides = [1, 1]} : vector<8x96xf32> to vector<8x32xf32>
    %46 = arith.mulf %45, %27 : vector<8x32xf32>
    %47 = vector.extract_strided_slice %42 {offsets = [0, 0], sizes = [8, 32], strides = [1, 1]} : vector<8x96xf32> to vector<8x32xf32>
    %48 = arith.mulf %47, %44 : vector<8x32xf32>
    %49 = arith.addf %46, %48 : vector<8x32xf32>
    %50 = vector.extract_strided_slice %42 {offsets = [0, 64], sizes = [8, 32], strides = [1, 1]} : vector<8x96xf32> to vector<8x32xf32>
    %51 = math.tanh %49 : vector<8x32xf32>
    %52 = arith.mulf %50, %51 : vector<8x32xf32>
    %c2_i32 = arith.constant 2 : i32
    %c8_i32_17 = arith.constant 8 : i32
    %53 = arith.muli %c2_i32, %c8_i32_17 : i32
    %54 = tpu.assume_multiple %53, 8 : i32
    %55 = arith.index_cast %54 : i32 to index
    %c0_18 = arith.constant 0 : index
    %56 = vector.load %arg12[%55, %c0_18] : memref<64x128xf32, #tpu.memory_space<vmem>>, vector<8x128xf32>
    %cst_19 = arith.constant dense<0.000000e+00> : vector<8x128xf32>
    %57 = tpu.matmul %52, %7, %cst_19 {dimension_numbers = #tpu.dot_dimension_numbers<[1], [0], [0], [1], [0, 0, 1, 1], [], []>} : vector<8x32xf32>, vector<32x128xf32>, vector<8x128xf32> -> vector<8x128xf32>
    %58 = arith.addf %56, %57 : vector<8x128xf32>
    %59 = vector.extract_strided_slice %58 {offsets = [0, 0], sizes = [8, 96], strides = [1, 1]} : vector<8x128xf32> to vector<8x96xf32>
    %60 = arith.negf %59 : vector<8x96xf32>
    %61 = math.exp %60 : vector<8x96xf32>
    %cst_20 = arith.constant 1.000000e+00 : f32
    %62 = vector.broadcast %cst_20 : f32 to vector<8x96xf32>
    %63 = arith.addf %62, %61 : vector<8x96xf32>
    %64 = arith.divf %62, %63 : vector<8x96xf32>
    %65 = vector.extract_strided_slice %58 {offsets = [0, 96], sizes = [8, 32], strides = [1, 1]} : vector<8x128xf32> to vector<8x32xf32>
    %66 = math.tanh %65 : vector<8x32xf32>
    %67 = vector.extract_strided_slice %64 {offsets = [0, 32], sizes = [8, 32], strides = [1, 1]} : vector<8x96xf32> to vector<8x32xf32>
    %68 = arith.mulf %67, %49 : vector<8x32xf32>
    %69 = vector.extract_strided_slice %64 {offsets = [0, 0], sizes = [8, 32], strides = [1, 1]} : vector<8x96xf32> to vector<8x32xf32>
    %70 = arith.mulf %69, %66 : vector<8x32xf32>
    %71 = arith.addf %68, %70 : vector<8x32xf32>
    %72 = vector.extract_strided_slice %64 {offsets = [0, 64], sizes = [8, 32], strides = [1, 1]} : vector<8x96xf32> to vector<8x32xf32>
    %73 = math.tanh %71 : vector<8x32xf32>
    %74 = arith.mulf %72, %73 : vector<8x32xf32>
    %c3_i32 = arith.constant 3 : i32
    %c8_i32_21 = arith.constant 8 : i32
    %75 = arith.muli %c3_i32, %c8_i32_21 : i32
    %76 = tpu.assume_multiple %75, 8 : i32
    %77 = arith.index_cast %76 : i32 to index
    %c0_22 = arith.constant 0 : index
    %78 = vector.load %arg12[%77, %c0_22] : memref<64x128xf32, #tpu.memory_space<vmem>>, vector<8x128xf32>
    %cst_23 = arith.constant dense<0.000000e+00> : vector<8x128xf32>
    %79 = tpu.matmul %74, %7, %cst_23 {dimension_numbers = #tpu.dot_dimension_numbers<[1], [0], [0], [1], [0, 0, 1, 1], [], []>} : vector<8x32xf32>, vector<32x128xf32>, vector<8x128xf32> -> vector<8x128xf32>
    %80 = arith.addf %78, %79 : vector<8x128xf32>
    %81 = vector.extract_strided_slice %80 {offsets = [0, 0], sizes = [8, 96], strides = [1, 1]} : vector<8x128xf32> to vector<8x96xf32>
    %82 = arith.negf %81 : vector<8x96xf32>
    %83 = math.exp %82 : vector<8x96xf32>
    %cst_24 = arith.constant 1.000000e+00 : f32
    %84 = vector.broadcast %cst_24 : f32 to vector<8x96xf32>
    %85 = arith.addf %84, %83 : vector<8x96xf32>
    %86 = arith.divf %84, %85 : vector<8x96xf32>
    %87 = vector.extract_strided_slice %80 {offsets = [0, 96], sizes = [8, 32], strides = [1, 1]} : vector<8x128xf32> to vector<8x32xf32>
    %88 = math.tanh %87 : vector<8x32xf32>
    %89 = vector.extract_strided_slice %86 {offsets = [0, 32], sizes = [8, 32], strides = [1, 1]} : vector<8x96xf32> to vector<8x32xf32>
    %90 = arith.mulf %89, %71 : vector<8x32xf32>
    %91 = vector.extract_strided_slice %86 {offsets = [0, 0], sizes = [8, 32], strides = [1, 1]} : vector<8x96xf32> to vector<8x32xf32>
    %92 = arith.mulf %91, %88 : vector<8x32xf32>
    %93 = arith.addf %90, %92 : vector<8x32xf32>
    %94 = vector.extract_strided_slice %86 {offsets = [0, 64], sizes = [8, 32], strides = [1, 1]} : vector<8x96xf32> to vector<8x32xf32>
    %95 = math.tanh %93 : vector<8x32xf32>
    %96 = arith.mulf %94, %95 : vector<8x32xf32>
    %c4_i32 = arith.constant 4 : i32
    %c8_i32_25 = arith.constant 8 : i32
    %97 = arith.muli %c4_i32, %c8_i32_25 : i32
    %98 = tpu.assume_multiple %97, 8 : i32
    %99 = arith.index_cast %98 : i32 to index
    %c0_26 = arith.constant 0 : index
    %100 = vector.load %arg12[%99, %c0_26] : memref<64x128xf32, #tpu.memory_space<vmem>>, vector<8x128xf32>
    %cst_27 = arith.constant dense<0.000000e+00> : vector<8x128xf32>
    %101 = tpu.matmul %96, %7, %cst_27 {dimension_numbers = #tpu.dot_dimension_numbers<[1], [0], [0], [1], [0, 0, 1, 1], [], []>} : vector<8x32xf32>, vector<32x128xf32>, vector<8x128xf32> -> vector<8x128xf32>
    %102 = arith.addf %100, %101 : vector<8x128xf32>
    %103 = vector.extract_strided_slice %102 {offsets = [0, 0], sizes = [8, 96], strides = [1, 1]} : vector<8x128xf32> to vector<8x96xf32>
    %104 = arith.negf %103 : vector<8x96xf32>
    %105 = math.exp %104 : vector<8x96xf32>
    %cst_28 = arith.constant 1.000000e+00 : f32
    %106 = vector.broadcast %cst_28 : f32 to vector<8x96xf32>
    %107 = arith.addf %106, %105 : vector<8x96xf32>
    %108 = arith.divf %106, %107 : vector<8x96xf32>
    %109 = vector.extract_strided_slice %102 {offsets = [0, 96], sizes = [8, 32], strides = [1, 1]} : vector<8x128xf32> to vector<8x32xf32>
    %110 = math.tanh %109 : vector<8x32xf32>
    %111 = vector.extract_strided_slice %108 {offsets = [0, 32], sizes = [8, 32], strides = [1, 1]} : vector<8x96xf32> to vector<8x32xf32>
    %112 = arith.mulf %111, %93 : vector<8x32xf32>
    %113 = vector.extract_strided_slice %108 {offsets = [0, 0], sizes = [8, 32], strides = [1, 1]} : vector<8x96xf32> to vector<8x32xf32>
    %114 = arith.mulf %113, %110 : vector<8x32xf32>
    %115 = arith.addf %112, %114 : vector<8x32xf32>
    %116 = vector.extract_strided_slice %108 {offsets = [0, 64], sizes = [8, 32], strides = [1, 1]} : vector<8x96xf32> to vector<8x32xf32>
    %117 = math.tanh %115 : vector<8x32xf32>
    %118 = arith.mulf %116, %117 : vector<8x32xf32>
    %c5_i32 = arith.constant 5 : i32
    %c8_i32_29 = arith.constant 8 : i32
    %119 = arith.muli %c5_i32, %c8_i32_29 : i32
    %120 = tpu.assume_multiple %119, 8 : i32
    %121 = arith.index_cast %120 : i32 to index
    %c0_30 = arith.constant 0 : index
    %122 = vector.load %arg12[%121, %c0_30] : memref<64x128xf32, #tpu.memory_space<vmem>>, vector<8x128xf32>
    %cst_31 = arith.constant dense<0.000000e+00> : vector<8x128xf32>
    %123 = tpu.matmul %118, %7, %cst_31 {dimension_numbers = #tpu.dot_dimension_numbers<[1], [0], [0], [1], [0, 0, 1, 1], [], []>} : vector<8x32xf32>, vector<32x128xf32>, vector<8x128xf32> -> vector<8x128xf32>
    %124 = arith.addf %122, %123 : vector<8x128xf32>
    %125 = vector.extract_strided_slice %124 {offsets = [0, 0], sizes = [8, 96], strides = [1, 1]} : vector<8x128xf32> to vector<8x96xf32>
    %126 = arith.negf %125 : vector<8x96xf32>
    %127 = math.exp %126 : vector<8x96xf32>
    %cst_32 = arith.constant 1.000000e+00 : f32
    %128 = vector.broadcast %cst_32 : f32 to vector<8x96xf32>
    %129 = arith.addf %128, %127 : vector<8x96xf32>
    %130 = arith.divf %128, %129 : vector<8x96xf32>
    %131 = vector.extract_strided_slice %124 {offsets = [0, 96], sizes = [8, 32], strides = [1, 1]} : vector<8x128xf32> to vector<8x32xf32>
    %132 = math.tanh %131 : vector<8x32xf32>
    %133 = vector.extract_strided_slice %130 {offsets = [0, 32], sizes = [8, 32], strides = [1, 1]} : vector<8x96xf32> to vector<8x32xf32>
    %134 = arith.mulf %133, %115 : vector<8x32xf32>
    %135 = vector.extract_strided_slice %130 {offsets = [0, 0], sizes = [8, 32], strides = [1, 1]} : vector<8x96xf32> to vector<8x32xf32>
    %136 = arith.mulf %135, %132 : vector<8x32xf32>
    %137 = arith.addf %134, %136 : vector<8x32xf32>
    %138 = vector.extract_strided_slice %130 {offsets = [0, 64], sizes = [8, 32], strides = [1, 1]} : vector<8x96xf32> to vector<8x32xf32>
    %139 = math.tanh %137 : vector<8x32xf32>
    %140 = arith.mulf %138, %139 : vector<8x32xf32>
    %c6_i32 = arith.constant 6 : i32
    %c8_i32_33 = arith.constant 8 : i32
    %141 = arith.muli %c6_i32, %c8_i32_33 : i32
    %142 = tpu.assume_multiple %141, 8 : i32
    %143 = arith.index_cast %142 : i32 to index
    %c0_34 = arith.constant 0 : index
    %144 = vector.load %arg12[%143, %c0_34] : memref<64x128xf32, #tpu.memory_space<vmem>>, vector<8x128xf32>
    %cst_35 = arith.constant dense<0.000000e+00> : vector<8x128xf32>
    %145 = tpu.matmul %140, %7, %cst_35 {dimension_numbers = #tpu.dot_dimension_numbers<[1], [0], [0], [1], [0, 0, 1, 1], [], []>} : vector<8x32xf32>, vector<32x128xf32>, vector<8x128xf32> -> vector<8x128xf32>
    %146 = arith.addf %144, %145 : vector<8x128xf32>
    %147 = vector.extract_strided_slice %146 {offsets = [0, 0], sizes = [8, 96], strides = [1, 1]} : vector<8x128xf32> to vector<8x96xf32>
    %148 = arith.negf %147 : vector<8x96xf32>
    %149 = math.exp %148 : vector<8x96xf32>
    %cst_36 = arith.constant 1.000000e+00 : f32
    %150 = vector.broadcast %cst_36 : f32 to vector<8x96xf32>
    %151 = arith.addf %150, %149 : vector<8x96xf32>
    %152 = arith.divf %150, %151 : vector<8x96xf32>
    %153 = vector.extract_strided_slice %146 {offsets = [0, 96], sizes = [8, 32], strides = [1, 1]} : vector<8x128xf32> to vector<8x32xf32>
    %154 = math.tanh %153 : vector<8x32xf32>
    %155 = vector.extract_strided_slice %152 {offsets = [0, 32], sizes = [8, 32], strides = [1, 1]} : vector<8x96xf32> to vector<8x32xf32>
    %156 = arith.mulf %155, %137 : vector<8x32xf32>
    %157 = vector.extract_strided_slice %152 {offsets = [0, 0], sizes = [8, 32], strides = [1, 1]} : vector<8x96xf32> to vector<8x32xf32>
    %158 = arith.mulf %157, %154 : vector<8x32xf32>
    %159 = arith.addf %156, %158 : vector<8x32xf32>
    %160 = vector.extract_strided_slice %152 {offsets = [0, 64], sizes = [8, 32], strides = [1, 1]} : vector<8x96xf32> to vector<8x32xf32>
    %161 = math.tanh %159 : vector<8x32xf32>
    %162 = arith.mulf %160, %161 : vector<8x32xf32>
    %c7_i32 = arith.constant 7 : i32
    %c8_i32_37 = arith.constant 8 : i32
    %163 = arith.muli %c7_i32, %c8_i32_37 : i32
    %164 = tpu.assume_multiple %163, 8 : i32
    %165 = arith.index_cast %164 : i32 to index
    %c0_38 = arith.constant 0 : index
    %166 = vector.load %arg12[%165, %c0_38] : memref<64x128xf32, #tpu.memory_space<vmem>>, vector<8x128xf32>
    %cst_39 = arith.constant dense<0.000000e+00> : vector<8x128xf32>
    %167 = tpu.matmul %162, %7, %cst_39 {dimension_numbers = #tpu.dot_dimension_numbers<[1], [0], [0], [1], [0, 0, 1, 1], [], []>} : vector<8x32xf32>, vector<32x128xf32>, vector<8x128xf32> -> vector<8x128xf32>
    %168 = arith.addf %166, %167 : vector<8x128xf32>
    %169 = vector.extract_strided_slice %168 {offsets = [0, 0], sizes = [8, 96], strides = [1, 1]} : vector<8x128xf32> to vector<8x96xf32>
    %170 = arith.negf %169 : vector<8x96xf32>
    %171 = math.exp %170 : vector<8x96xf32>
    %cst_40 = arith.constant 1.000000e+00 : f32
    %172 = vector.broadcast %cst_40 : f32 to vector<8x96xf32>
    %173 = arith.addf %172, %171 : vector<8x96xf32>
    %174 = arith.divf %172, %173 : vector<8x96xf32>
    %175 = vector.extract_strided_slice %168 {offsets = [0, 96], sizes = [8, 32], strides = [1, 1]} : vector<8x128xf32> to vector<8x32xf32>
    %176 = math.tanh %175 : vector<8x32xf32>
    %177 = vector.extract_strided_slice %174 {offsets = [0, 32], sizes = [8, 32], strides = [1, 1]} : vector<8x96xf32> to vector<8x32xf32>
    %178 = arith.mulf %177, %159 : vector<8x32xf32>
    %179 = vector.extract_strided_slice %174 {offsets = [0, 0], sizes = [8, 32], strides = [1, 1]} : vector<8x96xf32> to vector<8x32xf32>
    %180 = arith.mulf %179, %176 : vector<8x32xf32>
    %181 = arith.addf %178, %180 : vector<8x32xf32>
    %182 = vector.extract_strided_slice %174 {offsets = [0, 64], sizes = [8, 32], strides = [1, 1]} : vector<8x96xf32> to vector<8x32xf32>
    %183 = math.tanh %181 : vector<8x32xf32>
    %184 = arith.mulf %182, %183 : vector<8x32xf32>
    %c8_i32_41 = arith.constant 8 : i32
    %c0_42 = arith.constant 0 : index
    %c0_43 = arith.constant 0 : index
    %185 = vector.load %arg6[%c0_42, %c0_43] : memref<32x128xf32, #tpu.memory_space<vmem>>, vector<32x128xf32>
    %cst_44 = arith.constant dense<0.000000e+00> : vector<8x128xf32>
    %186 = tpu.matmul %184, %185, %cst_44 {dimension_numbers = #tpu.dot_dimension_numbers<[1], [0], [0], [1], [0, 0, 1, 1], [], []>} : vector<8x32xf32>, vector<32x128xf32>, vector<8x128xf32> -> vector<8x128xf32>
    %c0_45 = arith.constant 0 : index
    %c0_46 = arith.constant 0 : index
    %187 = vector.load %arg8[%c0_45, %c0_46] : memref<1x128xf32, #tpu.memory_space<vmem>>, vector<1x128xf32>
    %188 = vector.broadcast %187 : vector<1x128xf32> to vector<8x128xf32>
    %189 = arith.addf %186, %188 : vector<8x128xf32>
    %cst_47 = arith.constant 0.000000e+00 : f32
    %190 = vector.broadcast %cst_47 : f32 to vector<32x128xf32>
    %c0_48 = arith.constant 0 : index
    %c0_49 = arith.constant 0 : index
    %191 = vector.load %arg13[%c0_48, %c0_49] : memref<32x128xf32, #tpu.memory_space<vmem>>, vector<32x128xf32>
    tpu.vector_store %arg13[%c0_48, %c0_49], %190 {strides = array<i32>} : memref<32x128xf32, #tpu.memory_space<vmem>>, vector<32x128xf32>,
    %192 = vector.extract_strided_slice %189 {offsets = [0, 0], sizes = [2, 128], strides = [1, 1]} : vector<8x128xf32> to vector<2x128xf32>
    %c0_50 = arith.constant 0 : index
    %c0_51 = arith.constant 0 : index
    %193 = vector.load %arg13[%c0_50, %c0_51] : memref<32x128xf32, #tpu.memory_space<vmem>>, vector<2x128xf32>
    tpu.vector_store %arg13[%c0_50, %c0_51], %192 {strides = array<i32>} : memref<32x128xf32, #tpu.memory_space<vmem>>, vector<2x128xf32>,
    %194 = vector.extract_strided_slice %189 {offsets = [2, 0], sizes = [2, 128], strides = [1, 1]} : vector<8x128xf32> to vector<2x128xf32>
    %c8 = arith.constant 8 : index
    %c0_52 = arith.constant 0 : index
    %195 = vector.load %arg13[%c8, %c0_52] : memref<32x128xf32, #tpu.memory_space<vmem>>, vector<2x128xf32>
    tpu.vector_store %arg13[%c8, %c0_52], %194 {strides = array<i32>} : memref<32x128xf32, #tpu.memory_space<vmem>>, vector<2x128xf32>,
    %196 = vector.extract_strided_slice %189 {offsets = [4, 0], sizes = [2, 128], strides = [1, 1]} : vector<8x128xf32> to vector<2x128xf32>
    %c16 = arith.constant 16 : index
    %c0_53 = arith.constant 0 : index
    %197 = vector.load %arg13[%c16, %c0_53] : memref<32x128xf32, #tpu.memory_space<vmem>>, vector<2x128xf32>
    tpu.vector_store %arg13[%c16, %c0_53], %196 {strides = array<i32>} : memref<32x128xf32, #tpu.memory_space<vmem>>, vector<2x128xf32>,
    %198 = vector.extract_strided_slice %189 {offsets = [6, 0], sizes = [2, 128], strides = [1, 1]} : vector<8x128xf32> to vector<2x128xf32>
    %c24 = arith.constant 24 : index
    %c0_54 = arith.constant 0 : index
    %199 = vector.load %arg13[%c24, %c0_54] : memref<32x128xf32, #tpu.memory_space<vmem>>, vector<2x128xf32>
    tpu.vector_store %arg13[%c24, %c0_54], %198 {strides = array<i32>} : memref<32x128xf32, #tpu.memory_space<vmem>>, vector<2x128xf32>,
    %c0_55 = arith.constant 0 : index
    %c0_56 = arith.constant 0 : index
    %200 = vector.load %arg7[%c0_55, %c0_56] : memref<32x128xf32, #tpu.memory_space<vmem>>, vector<32x128xf32>
    %cst_57 = arith.constant 0.000000e+00 : f32
    %201 = vector.broadcast %cst_57 : f32 to vector<8x32xf32>
    %c0_i32_58 = arith.constant 0 : i32
    %c8_i32_59 = arith.constant 8 : i32
    %202 = arith.muli %c0_i32_58, %c8_i32_59 : i32
    %203 = tpu.assume_multiple %202, 8 : i32
    %204 = arith.index_cast %203 : i32 to index
    %c0_60 = arith.constant 0 : index
    %205 = vector.load %arg13[%204, %c0_60] : memref<32x128xf32, #tpu.memory_space<vmem>>, vector<8x128xf32>
    %cst_61 = arith.constant dense<0.000000e+00> : vector<8x128xf32>
    %206 = tpu.matmul %201, %200, %cst_61 {dimension_numbers = #tpu.dot_dimension_numbers<[1], [0], [0], [1], [0, 0, 1, 1], [], []>} : vector<8x32xf32>, vector<32x128xf32>, vector<8x128xf32> -> vector<8x128xf32>
    %207 = arith.addf %205, %206 : vector<8x128xf32>
    %208 = vector.extract_strided_slice %207 {offsets = [0, 0], sizes = [8, 96], strides = [1, 1]} : vector<8x128xf32> to vector<8x96xf32>
    %209 = arith.negf %208 : vector<8x96xf32>
    %210 = math.exp %209 : vector<8x96xf32>
    %cst_62 = arith.constant 1.000000e+00 : f32
    %211 = vector.broadcast %cst_62 : f32 to vector<8x96xf32>
    %212 = arith.addf %211, %210 : vector<8x96xf32>
    %213 = arith.divf %211, %212 : vector<8x96xf32>
    %214 = vector.extract_strided_slice %207 {offsets = [0, 96], sizes = [8, 32], strides = [1, 1]} : vector<8x128xf32> to vector<8x32xf32>
    %215 = math.tanh %214 : vector<8x32xf32>
    %216 = vector.extract_strided_slice %213 {offsets = [0, 32], sizes = [8, 32], strides = [1, 1]} : vector<8x96xf32> to vector<8x32xf32>
    %217 = arith.mulf %216, %201 : vector<8x32xf32>
    %218 = vector.extract_strided_slice %213 {offsets = [0, 0], sizes = [8, 32], strides = [1, 1]} : vector<8x96xf32> to vector<8x32xf32>
    %219 = arith.mulf %218, %215 : vector<8x32xf32>
    %220 = arith.addf %217, %219 : vector<8x32xf32>
    %221 = vector.extract_strided_slice %213 {offsets = [0, 64], sizes = [8, 32], strides = [1, 1]} : vector<8x96xf32> to vector<8x32xf32>
    %222 = math.tanh %220 : vector<8x32xf32>
    %223 = arith.mulf %221, %222 : vector<8x32xf32>
    %224 = arith.index_cast %203 : i32 to index
    %c0_63 = arith.constant 0 : index
    %225 = vector.load %arg2[%224, %c0_63] : memref<32x1xf32, #tpu.memory_space<vmem>>, vector<8x1xf32>
    %226 = vector.broadcast %225 : vector<8x1xf32> to vector<8x32xf32>
    %227 = arith.mulf %226, %223 : vector<8x32xf32>
    %228 = arith.addf %201, %227 : vector<8x32xf32>
    %c1_i32_64 = arith.constant 1 : i32
    %c8_i32_65 = arith.constant 8 : i32
    %229 = arith.muli %c1_i32_64, %c8_i32_65 : i32
    %230 = tpu.assume_multiple %229, 8 : i32
    %231 = arith.index_cast %230 : i32 to index
    %c0_66 = arith.constant 0 : index
    %232 = vector.load %arg13[%231, %c0_66] : memref<32x128xf32, #tpu.memory_space<vmem>>, vector<8x128xf32>
    %cst_67 = arith.constant dense<0.000000e+00> : vector<8x128xf32>
    %233 = tpu.matmul %223, %200, %cst_67 {dimension_numbers = #tpu.dot_dimension_numbers<[1], [0], [0], [1], [0, 0, 1, 1], [], []>} : vector<8x32xf32>, vector<32x128xf32>, vector<8x128xf32> -> vector<8x128xf32>
    %234 = arith.addf %232, %233 : vector<8x128xf32>
    %235 = vector.extract_strided_slice %234 {offsets = [0, 0], sizes = [8, 96], strides = [1, 1]} : vector<8x128xf32> to vector<8x96xf32>
    %236 = arith.negf %235 : vector<8x96xf32>
    %237 = math.exp %236 : vector<8x96xf32>
    %cst_68 = arith.constant 1.000000e+00 : f32
    %238 = vector.broadcast %cst_68 : f32 to vector<8x96xf32>
    %239 = arith.addf %238, %237 : vector<8x96xf32>
    %240 = arith.divf %238, %239 : vector<8x96xf32>
    %241 = vector.extract_strided_slice %234 {offsets = [0, 96], sizes = [8, 32], strides = [1, 1]} : vector<8x128xf32> to vector<8x32xf32>
    %242 = math.tanh %241 : vector<8x32xf32>
    %243 = vector.extract_strided_slice %240 {offsets = [0, 32], sizes = [8, 32], strides = [1, 1]} : vector<8x96xf32> to vector<8x32xf32>
    %244 = arith.mulf %243, %220 : vector<8x32xf32>
    %245 = vector.extract_strided_slice %240 {offsets = [0, 0], sizes = [8, 32], strides = [1, 1]} : vector<8x96xf32> to vector<8x32xf32>
    %246 = arith.mulf %245, %242 : vector<8x32xf32>
    %247 = arith.addf %244, %246 : vector<8x32xf32>
    %248 = vector.extract_strided_slice %240 {offsets = [0, 64], sizes = [8, 32], strides = [1, 1]} : vector<8x96xf32> to vector<8x32xf32>
    %249 = math.tanh %247 : vector<8x32xf32>
    %250 = arith.mulf %248, %249 : vector<8x32xf32>
    %251 = arith.index_cast %230 : i32 to index
    %c0_69 = arith.constant 0 : index
    %252 = vector.load %arg2[%251, %c0_69] : memref<32x1xf32, #tpu.memory_space<vmem>>, vector<8x1xf32>
    %253 = vector.broadcast %252 : vector<8x1xf32> to vector<8x32xf32>
    %254 = arith.mulf %253, %250 : vector<8x32xf32>
    %255 = arith.addf %228, %254 : vector<8x32xf32>
    %c2_i32_70 = arith.constant 2 : i32
    %c8_i32_71 = arith.constant 8 : i32
    %256 = arith.muli %c2_i32_70, %c8_i32_71 : i32
    %257 = tpu.assume_multiple %256, 8 : i32
    %258 = arith.index_cast %257 : i32 to index
    %c0_72 = arith.constant 0 : index
    %259 = vector.load %arg13[%258, %c0_72] : memref<32x128xf32, #tpu.memory_space<vmem>>, vector<8x128xf32>
    %cst_73 = arith.constant dense<0.000000e+00> : vector<8x128xf32>
    %260 = tpu.matmul %250, %200, %cst_73 {dimension_numbers = #tpu.dot_dimension_numbers<[1], [0], [0], [1], [0, 0, 1, 1], [], []>} : vector<8x32xf32>, vector<32x128xf32>, vector<8x128xf32> -> vector<8x128xf32>
    %261 = arith.addf %259, %260 : vector<8x128xf32>
    %262 = vector.extract_strided_slice %261 {offsets = [0, 0], sizes = [8, 96], strides = [1, 1]} : vector<8x128xf32> to vector<8x96xf32>
    %263 = arith.negf %262 : vector<8x96xf32>
    %264 = math.exp %263 : vector<8x96xf32>
    %cst_74 = arith.constant 1.000000e+00 : f32
    %265 = vector.broadcast %cst_74 : f32 to vector<8x96xf32>
    %266 = arith.addf %265, %264 : vector<8x96xf32>
    %267 = arith.divf %265, %266 : vector<8x96xf32>
    %268 = vector.extract_strided_slice %261 {offsets = [0, 96], sizes = [8, 32], strides = [1, 1]} : vector<8x128xf32> to vector<8x32xf32>
    %269 = math.tanh %268 : vector<8x32xf32>
    %270 = vector.extract_strided_slice %267 {offsets = [0, 32], sizes = [8, 32], strides = [1, 1]} : vector<8x96xf32> to vector<8x32xf32>
    %271 = arith.mulf %270, %247 : vector<8x32xf32>
    %272 = vector.extract_strided_slice %267 {offsets = [0, 0], sizes = [8, 32], strides = [1, 1]} : vector<8x96xf32> to vector<8x32xf32>
    %273 = arith.mulf %272, %269 : vector<8x32xf32>
    %274 = arith.addf %271, %273 : vector<8x32xf32>
    %275 = vector.extract_strided_slice %267 {offsets = [0, 64], sizes = [8, 32], strides = [1, 1]} : vector<8x96xf32> to vector<8x32xf32>
    %276 = math.tanh %274 : vector<8x32xf32>
    %277 = arith.mulf %275, %276 : vector<8x32xf32>
    %278 = arith.index_cast %257 : i32 to index
    %c0_75 = arith.constant 0 : index
    %279 = vector.load %arg2[%278, %c0_75] : memref<32x1xf32, #tpu.memory_space<vmem>>, vector<8x1xf32>
    %280 = vector.broadcast %279 : vector<8x1xf32> to vector<8x32xf32>
    %281 = arith.mulf %280, %277 : vector<8x32xf32>
    %282 = arith.addf %255, %281 : vector<8x32xf32>
    %c3_i32_76 = arith.constant 3 : i32
    %c8_i32_77 = arith.constant 8 : i32
    %283 = arith.muli %c3_i32_76, %c8_i32_77 : i32
    %284 = tpu.assume_multiple %283, 8 : i32
    %285 = arith.index_cast %284 : i32 to index
    %c0_78 = arith.constant 0 : index
    %286 = vector.load %arg13[%285, %c0_78] : memref<32x128xf32, #tpu.memory_space<vmem>>, vector<8x128xf32>
    %cst_79 = arith.constant dense<0.000000e+00> : vector<8x128xf32>
    %287 = tpu.matmul %277, %200, %cst_79 {dimension_numbers = #tpu.dot_dimension_numbers<[1], [0], [0], [1], [0, 0, 1, 1], [], []>} : vector<8x32xf32>, vector<32x128xf32>, vector<8x128xf32> -> vector<8x128xf32>
    %288 = arith.addf %286, %287 : vector<8x128xf32>
    %289 = vector.extract_strided_slice %288 {offsets = [0, 0], sizes = [8, 96], strides = [1, 1]} : vector<8x128xf32> to vector<8x96xf32>
    %290 = arith.negf %289 : vector<8x96xf32>
    %291 = math.exp %290 : vector<8x96xf32>
    %cst_80 = arith.constant 1.000000e+00 : f32
    %292 = vector.broadcast %cst_80 : f32 to vector<8x96xf32>
    %293 = arith.addf %292, %291 : vector<8x96xf32>
    %294 = arith.divf %292, %293 : vector<8x96xf32>
    %295 = vector.extract_strided_slice %288 {offsets = [0, 96], sizes = [8, 32], strides = [1, 1]} : vector<8x128xf32> to vector<8x32xf32>
    %296 = math.tanh %295 : vector<8x32xf32>
    %297 = vector.extract_strided_slice %294 {offsets = [0, 32], sizes = [8, 32], strides = [1, 1]} : vector<8x96xf32> to vector<8x32xf32>
    %298 = arith.mulf %297, %274 : vector<8x32xf32>
    %299 = vector.extract_strided_slice %294 {offsets = [0, 0], sizes = [8, 32], strides = [1, 1]} : vector<8x96xf32> to vector<8x32xf32>
    %300 = arith.mulf %299, %296 : vector<8x32xf32>
    %301 = arith.addf %298, %300 : vector<8x32xf32>
    %302 = vector.extract_strided_slice %294 {offsets = [0, 64], sizes = [8, 32], strides = [1, 1]} : vector<8x96xf32> to vector<8x32xf32>
    %303 = math.tanh %301 : vector<8x32xf32>
    %304 = arith.mulf %302, %303 : vector<8x32xf32>
    %305 = arith.index_cast %284 : i32 to index
    %c0_81 = arith.constant 0 : index
    %306 = vector.load %arg2[%305, %c0_81] : memref<32x1xf32, #tpu.memory_space<vmem>>, vector<8x1xf32>
    %307 = vector.broadcast %306 : vector<8x1xf32> to vector<8x32xf32>
    %308 = arith.mulf %307, %304 : vector<8x32xf32>
    %309 = arith.addf %282, %308 : vector<8x32xf32>
    %c4_i32_82 = arith.constant 4 : i32
    %cst_83 = arith.constant 2.500000e-01 : f32
    %310 = vector.broadcast %cst_83 : f32 to vector<8x32xf32>
    %311 = arith.mulf %309, %310 : vector<8x32xf32>
    %312 = math.tanh %311 : vector<8x32xf32>
    %c0_84 = arith.constant 0 : index
    %c0_85 = arith.constant 0 : index
    %313 = vector.load %arg9[%c0_84, %c0_85] : memref<32x32xf32, #tpu.memory_space<vmem>>, vector<32x32xf32>
    %cst_86 = arith.constant dense<0.000000e+00> : vector<8x32xf32>
    %314 = tpu.matmul %312, %313, %cst_86 {dimension_numbers = #tpu.dot_dimension_numbers<[1], [0], [0], [1], [0, 0, 1, 1], [], []>} : vector<8x32xf32>, vector<32x32xf32>, vector<8x32xf32> -> vector<8x32xf32>
    %c0_87 = arith.constant 0 : index
    %c0_88 = arith.constant 0 : index
    %315 = vector.load %arg10[%c0_87, %c0_88] : memref<1x32xf32, #tpu.memory_space<vmem>>, vector<1x32xf32>
    %316 = vector.broadcast %315 : vector<1x32xf32> to vector<8x32xf32>
    %317 = arith.addf %314, %316 : vector<8x32xf32>
    %c0_89 = arith.constant 0 : index
    %c0_90 = arith.constant 0 : index
    %318 = vector.load %arg11[%c0_89, %c0_90] : memref<8x32xf32, #tpu.memory_space<vmem>>, vector<8x32xf32>
    tpu.vector_store %arg11[%c0_89, %c0_90], %317 {strides = array<i32>} : memref<8x32xf32, #tpu.memory_space<vmem>>, vector<8x32xf32>,
    return
  }
  func.func @transform_0(%arg0: i32) -> (i32, i32) {
    %c0_i32 = arith.constant 0 : i32
    %c0_i32_0 = arith.constant 0 : i32
    return %arg0, %c0_i32 : i32, i32
  }
  func.func @transform_1(%arg0: i32) -> (i32, i32) {
    %c0_i32 = arith.constant 0 : i32
    %c0_i32_0 = arith.constant 0 : i32
    return %arg0, %c0_i32 : i32, i32
  }
  func.func @transform_2(%arg0: i32) -> (i32, i32) {
    %c0_i32 = arith.constant 0 : i32
    %c0_i32_0 = arith.constant 0 : i32
    %c0_i32_1 = arith.constant 0 : i32
    return %c0_i32, %c0_i32_0 : i32, i32
  }
  func.func @transform_3(%arg0: i32) -> (i32, i32) {
    %c0_i32 = arith.constant 0 : i32
    %c0_i32_0 = arith.constant 0 : i32
    %c0_i32_1 = arith.constant 0 : i32
    return %c0_i32, %c0_i32_0 : i32, i32
  }
  func.func @transform_4(%arg0: i32) -> (i32, i32) {
    %c0_i32 = arith.constant 0 : i32
    %c0_i32_0 = arith.constant 0 : i32
    %c0_i32_1 = arith.constant 0 : i32
    return %c0_i32, %c0_i32_0 : i32, i32
  }
  func.func @transform_5(%arg0: i32) -> (i32, i32) {
    %c0_i32 = arith.constant 0 : i32
    %c0_i32_0 = arith.constant 0 : i32
    %c0_i32_1 = arith.constant 0 : i32
    return %c0_i32, %c0_i32_0 : i32, i32
  }
  func.func @transform_6(%arg0: i32) -> (i32, i32) {
    %c0_i32 = arith.constant 0 : i32
    %c0_i32_0 = arith.constant 0 : i32
    %c0_i32_1 = arith.constant 0 : i32
    return %c0_i32, %c0_i32_0 : i32, i32
  }
  func.func @transform_7(%arg0: i32) -> (i32, i32) {
    %c0_i32 = arith.constant 0 : i32
    %c0_i32_0 = arith.constant 0 : i32
    %c0_i32_1 = arith.constant 0 : i32
    return %c0_i32, %c0_i32_0 : i32, i32
  }
  func.func @transform_8(%arg0: i32) -> (i32, i32) {
    %c0_i32 = arith.constant 0 : i32
    %c0_i32_0 = arith.constant 0 : i32
    %c0_i32_1 = arith.constant 0 : i32
    return %c0_i32, %c0_i32_0 : i32, i32
  }
  func.func @transform_9(%arg0: i32) -> (i32, i32) {
    %c0_i32 = arith.constant 0 : i32
    %c0_i32_0 = arith.constant 0 : i32
    %c0_i32_1 = arith.constant 0 : i32
    return %c0_i32, %c0_i32_0 : i32, i32
  }
  func.func @transform_10(%arg0: i32) -> (i32, i32) {
    %c0_i32 = arith.constant 0 : i32
    %c0_i32_0 = arith.constant 0 : i32
    return %arg0, %c0_i32 : i32, i32
  }
}

</mosaic_0001>

<bundles_post_ra>
// kernel: tpu_custom_call.1
= control target key start
LH: loop header
LB: loop body
LE: loop exit
PB: predicated region body
PF: predicated region fallthrough
CT: control target
= control target key end

     0   :  { %15 = vsyncpa [#allocation5], 0  ;;  %s2611_s0 = inlined_call_operand.vmem [shape: f32[64,32], index: 0, kind: input, shape index: {}]   ;;  %s2612_s1 = inlined_call_operand.vmem [shape: f32[32,1], index: 1, kind: input, shape index: {}]   ;;  %s2613_s2 = inlined_call_operand.vmem [shape: f32[32,128], index: 2, kind: input, shape index: {}]   ;;  %s2614_s3 = inlined_call_operand.vmem [shape: f32[32,128], index: 3, kind: input, shape index: {}]   ;;  %s2615_s4 = inlined_call_operand.vmem [shape: f32[1,128], index: 4, kind: input, shape index: {}]   ;;  %s2616_s5 = inlined_call_operand.vmem [shape: f32[32,128], index: 5, kind: input, shape index: {}]   ;;  %s2617_s6 = inlined_call_operand.hbm [shape: f32[32,128], index: 6, kind: input, shape index: {}]   ;;  %s2618_s7 = inlined_call_operand.vmem [shape: f32[1,128], index: 7, kind: input, shape index: {}]   ;;  %s2619_s8 = inlined_call_operand.hbm [shape: f32[32,32], index: 8, kind: input, shape index: {}]   ;;  %s2620_s9 = inlined_call_operand.vmem [shape: f32[1,32], index: 9, kind: input, shape index: {}]   ;;  %s2621_s10 = inlined_call_operand.hbm [shape: f32[8,32], index: 10, kind: output, shape index: {}]  }
   0x1   :  { %16 = vsyncpa [#allocation8], 0 }
   0x2   :  { %17 = vsyncpa [#allocation6], 0  ;;  %s2247_s13 = smov [#allocation4]   ;;  %s2175_s17 = scalar_lea.hbm %s2617_s6, 512 }
   0x3   :  { %s35_s14 = sshll.u32 %s2247_s13, 4  ;;  %p2176_p0 = scmp.ne.s32.totalorder %s2617_s6, %s2175_s17  ;;  %s36_s14 = int_to_ptr.vmem [resolvable:$true] %s35_s14 }
   0x4   :  { %p2179_p1 = scmp.lt.u32.totalorder %s2175_s17, %s2617_s6 }
   0x6   :  { %p2181_p2 = pnand %p2179_p1, %p2176_p0 }
   0x8   :  { %2184 = shalt.err (!%p2181_p2)
}
   0x9   :  { %s2185_s22 = scalar_lea.vmem %s36_s14, 512  ;;  %p2190_p4 = scmp.lt.s32.totalorder %s36_s14, %s36_s14 }
   0xa   :  { %p2186_p3 = scmp.ne.s32.totalorder %s36_s14, %s2185_s22  ;;  %p2191_p5 = scmp.lt.s32.totalorder %s2185_s22, %s2185_s22 }
   0xc   :  { %p2192_p6 = por %p2191_p5, %p2190_p4 }
   0xe   :  { %p2193_p7 = pnand %p2192_p6, %p2186_p3 }
  0x10   :  { %2196 = shalt.err (!%p2193_p7)
}
  0x11   :  { %s2248_s23 = smov 128   ;;  %s2249_s24 = smov 8  }
  0x12   :  { %41 = dma.hbm_to_vmem [thread:$0]  %s2617_s6, 512, %s36_s14, [#allocation5], %s2248_s23, %s2248_s23, %s2249_s24  }
  0x13   :  { %s2250_s27 = smov [#allocation7]   ;;  %s2197_s11 = scalar_lea.hbm %s2619_s8, 512 }
  0x14   :  { %s49_s28 = sshll.u32 %s2250_s27, 4  ;;  %p2198_p8 = scmp.ne.s32.totalorder %s2619_s8, %s2197_s11  ;;  %s50_s28 = int_to_ptr.vmem [resolvable:$true] %s49_s28 }
  0x15   :  { %p2201_p9 = scmp.lt.u32.totalorder %s2197_s11, %s2619_s8 }
  0x17   :  { %p2203_p10 = pnand %p2201_p9, %p2198_p8 }
  0x19   :  { %2206 = shalt.err (!%p2203_p10)
}
  0x1a   :  { %s2207_s17 = scalar_lea.vmem %s50_s28, 512  ;;  %p2212_p12 = scmp.lt.s32.totalorder %s50_s28, %s50_s28 }
  0x1b   :  { %p2208_p11 = scmp.ne.s32.totalorder %s50_s28, %s2207_s17  ;;  %p2213_p13 = scmp.lt.s32.totalorder %s2207_s17, %s2207_s17 }
  0x1d   :  { %p2214_p0 = por %p2213_p13, %p2212_p12 }
  0x1f   :  { %p2215_p1 = pnand %p2214_p0, %p2208_p11 }
  0x21   :  { %2218 = shalt.err (!%p2215_p1)
}
  0x22   :  { %55 = dma.hbm_to_vmem [thread:$0]  %s2619_s8, 512, %s50_s28, [#allocation8], %s2248_s23, %s2248_s23, %s2249_s24  }
  0x23   :  { %2241 = dma.done.wait [#allocation5], 512  }
  0x24   :  { %2242 = vsyncadd [#allocation5], 4294966784 }
  0x25   :  { %2243 = dma.done.wait [#allocation8], 512  }
  0x26   :  { %2244 = vsyncadd [#allocation8], 4294966784  ;;  %v2251_v0 = vmov 0.0|0.0   ;;  %vm2252_vm0 = vmmov 0   ;;  %v2253_v1 = vmov 0.0   ;;  %v72_v2 = vld [vmem:[%s2613_s2] sm:$0xff] }
  0x27   :  { %1980 = vmatprep.subr.bf16.mxu1 %v2251_v0  ;;  %1826 = vmatprep.mubr.msk.f32.mxu1 %vm2252_vm0, %v2253_v1  ;;  %1124 = vst [vmem:[#allocation3] sm:$0xff] %v2253_v1  ;;  %1125 = vst [vmem:[#allocation3 + $0x8] sm:$0xff] %v2253_v1  ;;  %v73_v3 = vld [vmem:[%s2613_s2 + $0x8] sm:$0xff]  ;;  %v221_v4 = vld [vmem:[%s2614_s3] sm:$0xff]  ;;  %vm83_vm1 = vcmask 261120   ;;  %s2254_s6 = smov 32  }
  0x28   :  { %1126 = vst [vmem:[#allocation3 + $0x10] sm:$0xff] %v2253_v1  ;;  %1127 = vst [vmem:[#allocation3 + $0x18] sm:$0xff] %v2253_v1  ;;  %v1972_v5 = vpack.c.bf16 %v73_v3, %v72_v2  ;;  %v222_v6 = vld [vmem:[%s2614_s3 + $0x8] sm:$0xff]  ;;  %v74_v7 = vld [vmem:[%s2613_s2 + $0x10] sm:$0xff]  ;;  %s2257_s20 = smov [#allocation9]  }
  0x29   :  { %v75_v8 = vld [vmem:[%s2613_s2 + $0x18] sm:$0xff]  ;;  %v2362_v9 = vpack.c.bf16 %v222_v6, %v221_v4  ;;  %v64_v11 = vld [vmem:[%s2611_s0] sm:$0xff]  ;;  %v223_v12 = vld [vmem:[%s2614_s3 + $0x10] sm:$0xff]  ;;  %s1668_s21 = sshll.u32 %s2257_s20, 4  ;;  %s1669_s21 = int_to_ptr.vmem [resolvable:$true] %s1668_s21 }
  0x2a   :  { %v1976_v10 = vpack.c.bf16 %v75_v8, %v74_v7  ;;  %v224_v13 = vld [vmem:[%s2614_s3 + $0x18] sm:$0xff]  ;;  %1973 = vmatprep.subr.bf16.mxu0 %v1972_v5  ;;  %1806 = vmatprep.mubr.msk.f32.mxu0 %vm83_vm1, %v64_v11  ;;  %v65_v15 = vld [vmem:[%s2611_s0 + $0x8] sm:$0xff]  ;;  %v2399_v16 = vld [vmem:[%s2615_s4] ss:$0 sm:$0xff]  ;;  %s2255_s4 = smov 64   ;;  %s2219_s22 = scalar_lea.vmem %s1669_s21, 128 }
  0x2b   :  { %1975 = vmatpush3.bf16.msra.mxu0 %v1972_v5  ;;  %1982 = vmatpush3.bf16.msra.mxu1 %v2362_v9  ;;  %v2375_v14 = vpack.c.bf16 %v224_v13, %v223_v12  ;;  %v66_v51 = vld [vmem:[%s2611_s0 + $0x10] sm:$0xff]  ;;  %v67_v52 = vld [vmem:[%s2611_s0 + $0x18] sm:$0xff]  ;;  %v68_v53 = vld [vmem:[%s2611_s0 + $0x20] sm:$0xff]  ;;  %p2220_p2 = scmp.ne.s32.totalorder %s1669_s21, %s2219_s22  ;;  %p2224_p3 = scmp.lt.s32.totalorder %s1669_s21, %s1669_s21 }
  0x2c   :  { %1977 = vmatprep.subr.bf16.mxu0 %v1976_v10  ;;  %1983 = vmatprep.subr.bf16.mxu1 %v2251_v0  ;;  %v69_v54 = vld [vmem:[%s2611_s0 + $0x28] sm:$0xff]  ;;  %v70_v55 = vld [vmem:[%s2611_s0 + $0x30] sm:$0xff]  ;;  %v71_v56 = vld [vmem:[%s2611_s0 + $0x38] sm:$0xff]  ;;  %p2225_p4 = scmp.lt.s32.totalorder %s2219_s22, %s2219_s22 }
  0x2e   :  { %p2226_p5 = por %p2225_p4, %p2224_p3 }
  0x2f   :  { %1979 = vmatpush3.bf16.msra.mxu0 %v1976_v10  ;;  %1985 = vmatpush3.bf16.msra.mxu1 %v2375_v14 }
  0x30   :  { %1986 = vmatprep.subr.bf16.mxu1 %v2251_v0  ;;  %1992 = vmatprep.subr.bf16.mxu0 %v2251_v0  ;;  %p2227_p6 = pnand %p2226_p5, %p2220_p2 }
  0x32   :  { %1807 = vmatmul.mubr.msk.f32.vlgmr.msra.gmra.mrb[0].mxu0 %vm83_vm1, %v65_v15  ;;  %1827 = vmatmul.mubr.f32.vlgmr.msra.gmra.mrb[0].mxu1 %v2253_v1 }
  0x33   :  { %1988 = vmatpush3.bf16.msra.mxu1 %v2362_v9  ;;  %1837 = vmatprep.mubr.msk.f32.mxu1 %vm2252_vm0, %v2253_v1 }
  0x34   :  { %1989 = vmatprep.subr.bf16.mxu1 %v2251_v0  ;;  %1994 = vmatpush3.bf16.msra.mxu0 %v2362_v9 }
  0x35   :  { %1995 = vmatprep.subr.bf16.mxu0 %v2251_v0  ;;  %1809 = vmatprep.mubr.msk.f32.mxu0 %vm83_vm1, %v66_v51 }
  0x36   :  { %1810 = vmatmul.mubr.msk.f32.gmra.mrb[2].mxu0 %vm83_vm1, %v67_v52 }
  0x37   :  { %1991 = vmatpush3.bf16.msra.mxu1 %v2375_v14  ;;  %1812 = vmatprep.mubr.msk.f32.mxu0 %vm83_vm1, %v68_v53 }
  0x38   :  { %1997 = vmatpush3.bf16.msra.mxu0 %v2375_v14  ;;  %1998 = vmatprep.subr.bf16.mxu1 %v2251_v0 }
  0x39   :  { %2004 = vmatprep.subr.bf16.mxu0 %v2251_v0 }
  0x3a   :  { %1813 = vmatmul.mubr.msk.f32.gmra.mrb[4].mxu0 %vm83_vm1, %v69_v54 }
  0x3b   :  { %1815 = vmatprep.mubr.msk.f32.mxu0 %vm83_vm1, %v70_v55 }
  0x3e   :  { %1816 = vmatmul.mubr.msk.f32.gmra.mrb[6].mxu0 %vm83_vm1, %v71_v56 }
  0x3f   :  { %1848 = vmatprep.mubr.msk.f32.mxu0 %vm2252_vm0, %v2253_v1 }
 0x105   :  { %v1808_v17 = vpop.f32.mrb[0].mxu0  ;;  %v295_v18 = vpop.f32.mrb[0].mxu1 }
 0x106   :  { %v174_v19 = vpop.f32.mrb[1].mxu0  ;;  %v1828_v20 = vpop.f32.mrb[1].mxu1  ;;  %v180_v37 = vadd.f32 %v1808_v17, %v2399_v16 }
 0x107   :  { %v175_v21 = vadd.f32 %v2399_v16, %v174_v19 }
 0x109   :  { %v299_v22 = vadd.f32 %v295_v18, %v175_v21  ;;  %v1811_v60 = vpop.f32.mrb[2].mxu0 }
 0x10a   :  { %v184_v61 = vpop.f32.mrb[3].mxu0 }
 0x10b   :  { %2077 = vtanh.f32 %v299_v22  ;;  %v1687_v24 = vmul.f32 -1.442695, %v299_v22  ;;  %v185_v5 = vadd.f32 %v2399_v16, %v184_v61 }
 0x10d   :  { %2079 = vpow2.f32 %v1687_v24  ;;  %v2444_v62 = vpop.f32.mrb[4].mxu0 }
 0x10e   :  { %v2446_v63 = vpop.f32.mrb[5].mxu0 }
 0x111   :  { %v2448_v2 = vpop.f32.mrb[6].mxu0 }
 0x112   :  { %v2450_v3 = vpop.f32.mrb[7].mxu0 }
 0x115   :  { %v2078_v23 = vpop.eup %2077 }
 0x116   :  { %309 = vrot.lane.b32.xlu0 %v2078_v23, %s2254_s6 }
 0x117   :  { %v2080_v25 = vpop.eup %2079 }
 0x118   :  { %v303_v26 = vadd.f32 1.0, %v2080_v25 }
 0x11a   :  { %2081 = vrcp.f32 %v303_v26  ;;  %v190_v26 = vadd.f32 %v1811_v60, %v2399_v16 }
 0x124   :  { %v2082_v27 = vpop.eup %2081 }
 0x125   :  { %v307_v30 = vmul.f32 0.0, %v2082_v27 }
 0x188   :  { %v310_v28 = vpop.permute.xlu0 %309 }
 0x189   :  { %v312_v29 = vmul.f32 %v2082_v27, %v310_v28 }
 0x18b   :  { %314 = vrot.lane.b32.xlu0 %v312_v29, %s2254_s6 }
 0x1fd   :  { %v315_v31 = vpop.permute.xlu0 %314 }
 0x1fe   :  { %v317_v32 = vadd.f32 %v315_v31, %v307_v30 }
 0x200   :  { %2083 = vtanh.f32 %v317_v32 }
 0x20a   :  { %v2084_v33 = vpop.eup %2083 }
 0x20b   :  { %320 = vrot.lane.b32.xlu1 %v2084_v33, %s2254_s6 }
 0x27d   :  { %v321_v34 = vpop.permute.xlu1 %320 }
 0x27e   :  { %v323_v35 = vmul.f32 %v2082_v27, %v321_v34 }
 0x280   :  { %327 = vrot.lane.b32.xlu1 %v323_v35, %s2255_s4 }
 0x2f2   :  { %v328_v36 = vpop.permute.xlu1 %327 }
 0x2f3   :  { %1838 = vmatmul.mubr.msk.f32.vlgmr.msra.gmra.mrb[2].mxu1 %vm83_vm1, %v328_v36 }
 0x2f4   :  { %2000 = vmatpush3.bf16.msra.mxu1 %v2362_v9  ;;  %1859 = vmatprep.mubr.msk.f32.mxu1 %vm2252_vm0, %v2253_v1 }
 0x2f5   :  { %2001 = vmatprep.subr.bf16.mxu1 %v2251_v0 }
 0x2f8   :  { %2003 = vmatpush3.bf16.msra.mxu1 %v2375_v14 }
 0x2f9   :  { %2010 = vmatprep.subr.bf16.mxu1 %v2251_v0 }
 0x3c6   :  { %v397_v38 = vpop.f32.mrb[2].mxu1 }
 0x3c7   :  { %v401_v39 = vadd.f32 %v397_v38, %v180_v37  ;;  %v1839_v40 = vpop.f32.mrb[3].mxu1 }
 0x3c9   :  { %2085 = vtanh.f32 %v401_v39  ;;  %v1689_v42 = vmul.f32 -1.442695, %v401_v39 }
 0x3cb   :  { %2087 = vpow2.f32 %v1689_v42 }
 0x3d3   :  { %v2086_v41 = vpop.eup %2085 }
 0x3d4   :  { %411 = vrot.lane.b32.xlu0 %v2086_v41, %s2254_s6 }
 0x3d5   :  { %v2088_v43 = vpop.eup %2087 }
 0x3d6   :  { %v405_v44 = vadd.f32 1.0, %v2088_v43 }
 0x3d8   :  { %2089 = vrcp.f32 %v405_v44  ;;  %v195_v44 = vadd.f32 %v2399_v16, %v2446_v63  ;;  %v200_v63 = vadd.f32 %v2444_v62, %v2399_v16 }
 0x3e2   :  { %v2090_v45 = vpop.eup %2089 }
 0x3e3   :  { %v409_v48 = vmul.f32 %v2090_v45, %v317_v32 }
 0x446   :  { %v412_v46 = vpop.permute.xlu0 %411 }
 0x447   :  { %v414_v47 = vmul.f32 %v2090_v45, %v412_v46 }
 0x449   :  { %416 = vrot.lane.b32.xlu1 %v414_v47, %s2254_s6 }
 0x4bb   :  { %v417_v49 = vpop.permute.xlu1 %416 }
 0x4bc   :  { %v419_v50 = vadd.f32 %v417_v49, %v409_v48 }
 0x4be   :  { %2091 = vtanh.f32 %v419_v50 }
 0x4c8   :  { %v2092_v57 = vpop.eup %2091 }
 0x4c9   :  { %422 = vrot.lane.b32.xlu0 %v2092_v57, %s2254_s6 }
 0x53b   :  { %v423_v58 = vpop.permute.xlu0 %422 }
 0x53c   :  { %v425_v59 = vmul.f32 %v2090_v45, %v423_v58 }
 0x53e   :  { %429 = vrot.lane.b32.xlu1 %v425_v59, %s2255_s4 }
 0x5b0   :  { %v430_v4 = vpop.permute.xlu1 %429 }
 0x5b1   :  { %1849 = vmatmul.mubr.msk.f32.vlgmr.msra.gmra.mrb[8].mxu0 %vm83_vm1, %v430_v4 }
 0x5b2   :  { %2006 = vmatpush3.bf16.msra.mxu0 %v2362_v9  ;;  %1870 = vmatprep.mubr.msk.f32.mxu0 %vm2252_vm0, %v2253_v1 }
 0x5b3   :  { %2007 = vmatprep.subr.bf16.mxu0 %v2251_v0 }
 0x5b6   :  { %2009 = vmatpush3.bf16.msra.mxu0 %v2375_v14 }
 0x5b7   :  { %2016 = vmatprep.subr.bf16.mxu0 %v2251_v0 }
 0x684   :  { %v499_v6 = vpop.f32.mrb[8].mxu0 }
 0x685   :  { %v503_v7 = vadd.f32 %v499_v6, %v185_v5  ;;  %v1850_v8 = vpop.f32.mrb[9].mxu0 }
 0x687   :  { %2093 = vtanh.f32 %v503_v7  ;;  %v1691_v11 = vmul.f32 -1.442695, %v503_v7 }
 0x689   :  { %2095 = vpow2.f32 %v1691_v11 }
 0x691   :  { %v2094_v10 = vpop.eup %2093 }
 0x692   :  { %513 = vrot.lane.b32.xlu0 %v2094_v10, %s2254_s6 }
 0x693   :  { %v2096_v12 = vpop.eup %2095 }
 0x694   :  { %v507_v13 = vadd.f32 1.0, %v2096_v12 }
 0x696   :  { %2097 = vrcp.f32 %v507_v13 }
 0x6a0   :  { %v2098_v15 = vpop.eup %2097 }
 0x6a1   :  { %v511_v19 = vmul.f32 %v2098_v15, %v419_v50 }
 0x704   :  { %v514_v17 = vpop.permute.xlu0 %513 }
 0x705   :  { %v516_v18 = vmul.f32 %v2098_v15, %v514_v17 }
 0x707   :  { %518 = vrot.lane.b32.xlu1 %v516_v18, %s2254_s6 }
 0x779   :  { %v519_v20 = vpop.permute.xlu1 %518 }
 0x77a   :  { %v521_v21 = vadd.f32 %v519_v20, %v511_v19 }
 0x77c   :  { %2099 = vtanh.f32 %v521_v21 }
 0x786   :  { %v2100_v22 = vpop.eup %2099 }
 0x787   :  { %524 = vrot.lane.b32.xlu0 %v2100_v22, %s2254_s6 }
 0x7f9   :  { %v525_v23 = vpop.permute.xlu0 %524 }
 0x7fa   :  { %v527_v24 = vmul.f32 %v2098_v15, %v525_v23 }
 0x7fc   :  { %531 = vrot.lane.b32.xlu1 %v527_v24, %s2255_s4 }
 0x86e   :  { %v532_v25 = vpop.permute.xlu1 %531 }
 0x86f   :  { %1860 = vmatmul.mubr.msk.f32.vlgmr.msra.gmra.mrb[4].mxu1 %vm83_vm1, %v532_v25 }
 0x870   :  { %2012 = vmatpush3.bf16.msra.mxu1 %v2362_v9  ;;  %1881 = vmatprep.mubr.msk.f32.mxu1 %vm2252_vm0, %v2253_v1 }
 0x871   :  { %2013 = vmatprep.subr.bf16.mxu1 %v2251_v0 }
 0x874   :  { %2015 = vmatpush3.bf16.msra.mxu1 %v2375_v14 }
 0x875   :  { %2022 = vmatprep.subr.bf16.mxu1 %v2251_v0 }
 0x942   :  { %v601_v27 = vpop.f32.mrb[4].mxu1 }
 0x943   :  { %v605_v28 = vadd.f32 %v601_v27, %v190_v26  ;;  %v1861_v29 = vpop.f32.mrb[5].mxu1 }
 0x945   :  { %2101 = vtanh.f32 %v605_v28  ;;  %v1693_v31 = vmul.f32 -1.442695, %v605_v28 }
 0x947   :  { %2103 = vpow2.f32 %v1693_v31 }
 0x94f   :  { %v2102_v30 = vpop.eup %2101 }
 0x950   :  { %615 = vrot.lane.b32.xlu0 %v2102_v30, %s2254_s6 }
 0x951   :  { %v2104_v32 = vpop.eup %2103 }
 0x952   :  { %v609_v33 = vadd.f32 1.0, %v2104_v32 }
 0x954   :  { %2105 = vrcp.f32 %v609_v33 }
 0x95e   :  { %v2106_v34 = vpop.eup %2105 }
 0x95f   :  { %v613_v37 = vmul.f32 %v2106_v34, %v521_v21  ;;  %v205_v21 = vadd.f32 %v2399_v16, %v2450_v3 }
 0x9c2   :  { %v616_v35 = vpop.permute.xlu0 %615 }
 0x9c3   :  { %v618_v36 = vmul.f32 %v2106_v34, %v616_v35 }
 0x9c5   :  { %620 = vrot.lane.b32.xlu1 %v618_v36, %s2254_s6 }
 0xa37   :  { %v621_v38 = vpop.permute.xlu1 %620 }
 0xa38   :  { %v623_v39 = vadd.f32 %v621_v38, %v613_v37  ;;  %v210_v38 = vadd.f32 %v2448_v2, %v2399_v16  ;;  %v1038_v2 = vld [vmem:[%s2616_s5] sm:$0xff] }
 0xa3a   :  { %2107 = vtanh.f32 %v623_v39 }
 0xa44   :  { %v2108_v40 = vpop.eup %2107 }
 0xa45   :  { %626 = vrot.lane.b32.xlu0 %v2108_v40, %s2254_s6 }
 0xab7   :  { %v627_v41 = vpop.permute.xlu0 %626 }
 0xab8   :  { %v629_v42 = vmul.f32 %v2106_v34, %v627_v41 }
 0xaba   :  { %633 = vrot.lane.b32.xlu1 %v629_v42, %s2255_s4 }
 0xb2c   :  { %v634_v43 = vpop.permute.xlu1 %633 }
 0xb2d   :  { %1871 = vmatmul.mubr.msk.f32.vlgmr.msra.gmra.mrb[10].mxu0 %vm83_vm1, %v634_v43 }
 0xb2e   :  { %2018 = vmatpush3.bf16.msra.mxu0 %v2362_v9  ;;  %1892 = vmatprep.mubr.msk.f32.mxu0 %vm2252_vm0, %v2253_v1 }
 0xb2f   :  { %2019 = vmatprep.subr.bf16.mxu0 %v2251_v0 }
 0xb32   :  { %2021 = vmatpush3.bf16.msra.mxu0 %v2375_v14 }
 0xb33   :  { %2028 = vmatprep.subr.bf16.mxu0 %v2251_v0 }
 0xc00   :  { %v703_v45 = vpop.f32.mrb[10].mxu0 }
 0xc01   :  { %v707_v46 = vadd.f32 %v703_v45, %v195_v44  ;;  %v1872_v47 = vpop.f32.mrb[11].mxu0 }
 0xc03   :  { %2109 = vtanh.f32 %v707_v46  ;;  %v1695_v49 = vmul.f32 -1.442695, %v707_v46 }
 0xc05   :  { %2111 = vpow2.f32 %v1695_v49 }
 0xc0d   :  { %v2110_v48 = vpop.eup %2109 }
 0xc0e   :  { %717 = vrot.lane.b32.xlu0 %v2110_v48, %s2254_s6 }
 0xc0f   :  { %v2112_v50 = vpop.eup %2111 }
 0xc10   :  { %v711_v51 = vadd.f32 1.0, %v2112_v50 }
 0xc12   :  { %2113 = vrcp.f32 %v711_v51  ;;  %v1039_v51 = vld [vmem:[%s2616_s5 + $0x8] sm:$0xff] }
 0xc1c   :  { %v2114_v52 = vpop.eup %2113 }
 0xc1d   :  { %v715_v55 = vmul.f32 %v2114_v52, %v623_v39 }
 0xc80   :  { %v718_v53 = vpop.permute.xlu0 %717 }
 0xc81   :  { %v720_v54 = vmul.f32 %v2114_v52, %v718_v53  ;;  %v2029_v53 = vpack.c.bf16 %v1039_v51, %v1038_v2 }
 0xc83   :  { %722 = vrot.lane.b32.xlu1 %v720_v54, %s2254_s6  ;;  %v1041_v54 = vld [vmem:[%s2616_s5 + $0x18] sm:$0xff] }
 0xcf5   :  { %v723_v56 = vpop.permute.xlu1 %722 }
 0xcf6   :  { %v725_v57 = vadd.f32 %v723_v56, %v715_v55 }
 0xcf8   :  { %2115 = vtanh.f32 %v725_v57 }
 0xd02   :  { %v2116_v58 = vpop.eup %2115 }
 0xd03   :  { %728 = vrot.lane.b32.xlu0 %v2116_v58, %s2254_s6  ;;  %v1133_v58 = vld [vmem:[#allocation4 + $0x8] sm:$0xff] }
 0xd75   :  { %v729_v59 = vpop.permute.xlu0 %728 }
 0xd76   :  { %v731_v60 = vmul.f32 %v2114_v52, %v729_v59  ;;  %v1040_v52 = vld [vmem:[%s2616_s5 + $0x10] sm:$0xff] }
 0xd77   :  { %v2032_v55 = vpack.c.bf16 %v1041_v54, %v1040_v52 }
 0xd78   :  { %735 = vrot.lane.b32.xlu1 %v731_v60, %s2255_s4  ;;  %v1134_v60 = vld [vmem:[#allocation4 + $0x10] sm:$0xff] }
 0xdea   :  { %v736_v61 = vpop.permute.xlu1 %735 }
 0xdeb   :  { %1882 = vmatmul.mubr.msk.f32.vlgmr.msra.gmra.mrb[6].mxu1 %vm83_vm1, %v736_v61  ;;  %v1135_v61 = vld [vmem:[#allocation4 + $0x18] sm:$0xff] }
 0xdec   :  { %2024 = vmatpush3.bf16.msra.mxu1 %v2362_v9  ;;  %1903 = vmatprep.mubr.msk.f32.mxu1 %vm2252_vm0, %v2253_v1 }
 0xded   :  { %2025 = vmatprep.subr.bf16.mxu1 %v2251_v0 }
 0xdf0   :  { %2027 = vmatpush3.bf16.msra.mxu1 %v2375_v14 }
 0xdf1   :  { %2034 = vmatprep.subr.bf16.mxu1 %v2251_v0 }
 0xebe   :  { %v805_v4 = vpop.f32.mrb[6].mxu1 }
 0xebf   :  { %v809_v5 = vadd.f32 %v805_v4, %v200_v63  ;;  %v1883_v6 = vpop.f32.mrb[7].mxu1  ;;  %v2038_v63 = vpack.c.bf16 %v1135_v61, %v1134_v60  ;;  %v2256_v61 = vmov 0  }
 0xec0   :  { %2075 = vset.pattern.permute.xlu0 %v2256_v61  ;;  %2076 = vset.pattern.permute.xlu1 %v2256_v61 }
 0xec1   :  { %2117 = vtanh.f32 %v809_v5  ;;  %v1697_v9 = vmul.f32 -1.442695, %v809_v5 }
 0xec3   :  { %2119 = vpow2.f32 %v1697_v9 }
 0xecb   :  { %v2118_v7 = vpop.eup %2117 }
 0xecc   :  { %819 = vrot.lane.b32.xlu0 %v2118_v7, %s2254_s6 }
 0xecd   :  { %v2120_v8 = vpop.eup %2119 }
 0xece   :  { %v813_v10 = vadd.f32 1.0, %v2120_v8  ;;  %v1702_v8 = vld [vmem:[%s2618_s7] ss:$0 sm:$0xff] }
 0xed0   :  { %2121 = vrcp.f32 %v813_v10 }
 0xeda   :  { %v2122_v11 = vpop.eup %2121 }
 0xedb   :  { %v817_v13 = vmul.f32 %v2122_v11, %v725_v57  ;;  %v1132_v57 = vld [vmem:[#allocation4] sm:$0xff] }
 0xedc   :  { %v2035_v59 = vpack.c.bf16 %v1133_v58, %v1132_v57 }
 0xf3e   :  { %v820_v12 = vpop.permute.xlu0 %819 }
 0xf3f   :  { %v822_v14 = vmul.f32 %v2122_v11, %v820_v12 }
 0xf41   :  { %824 = vrot.lane.b32.xlu1 %v822_v14, %s2254_s6 }
 0xfb3   :  { %v825_v15 = vpop.permute.xlu1 %824 }
 0xfb4   :  { %v827_v62 = vadd.f32 %v825_v15, %v817_v13 }
 0xfb6   :  { %2123 = vtanh.f32 %v827_v62 }
 0xfc0   :  { %v2124_v17 = vpop.eup %2123 }
 0xfc1   :  { %830 = vrot.lane.b32.xlu0 %v2124_v17, %s2254_s6 }
0x1033   :  { %v831_v18 = vpop.permute.xlu0 %830 }
0x1034   :  { %v833_v19 = vmul.f32 %v2122_v11, %v831_v18 }
0x1036   :  { %837 = vrot.lane.b32.xlu1 %v833_v19, %s2255_s4 }
0x10a8   :  { %v838_v20 = vpop.permute.xlu1 %837 }
0x10a9   :  { %1893 = vmatmul.mubr.msk.f32.vlgmr.msra.gmra.mrb[12].mxu0 %vm83_vm1, %v838_v20 }
0x10aa   :  { %1914 = vmatprep.mubr.msk.f32.mxu0 %vm2252_vm0, %v2253_v1  ;;  %2030 = vmatpush3.bf16.msra.mxu0 %v2029_v53 }
0x10ab   :  { %2031 = vmatprep.subr.bf16.mxu0 %v2251_v0 }
0x10ae   :  { %2033 = vmatpush3.bf16.msra.mxu0 %v2032_v55 }
0x10af   :  { %2040 = vmatprep.subr.bf16.mxu0 %v2251_v0 }
0x117c   :  { %v907_v22 = vpop.f32.mrb[12].mxu0 }
0x117d   :  { %v911_v23 = vadd.f32 %v907_v22, %v205_v21  ;;  %v1894_v24 = vpop.f32.mrb[13].mxu0 }
0x117f   :  { %2125 = vtanh.f32 %v911_v23  ;;  %v1699_v26 = vmul.f32 -1.442695, %v911_v23 }
0x1181   :  { %2127 = vpow2.f32 %v1699_v26 }
0x1189   :  { %v2126_v25 = vpop.eup %2125 }
0x118a   :  { %921 = vrot.lane.b32.xlu0 %v2126_v25, %s2254_s6 }
0x118b   :  { %v2128_v27 = vpop.eup %2127 }
0x118c   :  { %v915_v28 = vadd.f32 1.0, %v2128_v27 }
0x118e   :  { %2129 = vrcp.f32 %v915_v28 }
0x1198   :  { %v2130_v29 = vpop.eup %2129 }
0x1199   :  { %v919_v32 = vmul.f32 %v2130_v29, %v827_v62 }
0x11fc   :  { %v922_v30 = vpop.permute.xlu0 %921 }
0x11fd   :  { %v924_v31 = vmul.f32 %v2130_v29, %v922_v30 }
0x11ff   :  { %926 = vrot.lane.b32.xlu1 %v924_v31, %s2254_s6 }
0x1271   :  { %v927_v33 = vpop.permute.xlu1 %926 }
0x1272   :  { %v929_v3 = vadd.f32 %v927_v33, %v919_v32 }
0x1274   :  { %2131 = vtanh.f32 %v929_v3 }
0x127e   :  { %v2132_v34 = vpop.eup %2131 }
0x127f   :  { %932 = vrot.lane.b32.xlu0 %v2132_v34, %s2254_s6 }
0x12f1   :  { %v933_v35 = vpop.permute.xlu0 %932 }
0x12f2   :  { %v935_v36 = vmul.f32 %v2130_v29, %v933_v35 }
0x12f4   :  { %939 = vrot.lane.b32.xlu1 %v935_v36, %s2255_s4 }
0x1366   :  { %v940_v37 = vpop.permute.xlu1 %939 }
0x1367   :  { %1904 = vmatmul.mubr.msk.f32.vlgmr.msra.gmra.mrb[8].mxu1 %vm83_vm1, %v940_v37 }
0x1368   :  { %1925 = vmatprep.mubr.msk.f32.mxu1 %vm2252_vm0, %v2253_v1  ;;  %2036 = vmatpush3.bf16.msra.mxu1 %v2035_v59 }
0x1369   :  { %2037 = vmatprep.subr.bf16.mxu1 %v2251_v0 }
0x136c   :  { %2039 = vmatpush3.bf16.msra.mxu1 %v2038_v63 }
0x136d   :  { %2046 = vmatprep.subr.bf16.mxu1 %v2251_v0 }
0x136f   :  { %1926 = vmatmul.mubr.f32.vlgmr.msra.gmra.mrb[10].mxu1 %v2253_v1 }
0x1370   :  { %2048 = vmatpush3.bf16.msra.mxu1 %v2035_v59  ;;  %1947 = vmatprep.mubr.msk.f32.mxu1 %vm2252_vm0, %v2253_v1 }
0x1371   :  { %2049 = vmatprep.subr.bf16.mxu1 %v2251_v0 }
0x1374   :  { %2051 = vmatpush3.bf16.msra.mxu1 %v2038_v63 }
0x1375   :  { %2058 = vmatprep.subr.bf16.mxu1 %v2251_v0 }
0x143a   :  { %v1009_v39 = vpop.f32.mrb[8].mxu1 }
0x143b   :  { %v1013_v40 = vadd.f32 %v1009_v39, %v210_v38  ;;  %v1905_v41 = vpop.f32.mrb[9].mxu1 }
0x143d   :  { %2133 = vtanh.f32 %v1013_v40  ;;  %v1701_v43 = vmul.f32 -1.442695, %v1013_v40 }
0x143f   :  { %2135 = vpow2.f32 %v1701_v43 }
0x1442   :  { %v1203_v7 = vpop.f32.mrb[10].mxu1 }
0x1443   :  { %v1927_v9 = vpop.f32.mrb[11].mxu1 }
0x1444   :  { %v1232_v9 = vld [vmem:[%s2612_s1] sm:$0xff] }
0x1447   :  { %v2134_v42 = vpop.eup %2133 }
0x1448   :  { %1023 = vrot.lane.b32.xlu0 %v2134_v42, %s2254_s6 }
0x1449   :  { %v2136_v44 = vpop.eup %2135 }
0x144a   :  { %v1017_v45 = vadd.f32 1.0, %v2136_v44 }
0x144c   :  { %2137 = vrcp.f32 %v1017_v45 }
0x1456   :  { %v2138_v46 = vpop.eup %2137 }
0x1457   :  { %v1021_v49 = vmul.f32 %v2138_v46, %v929_v3 }
0x14ba   :  { %v1024_v47 = vpop.permute.xlu0 %1023 }
0x14bb   :  { %v1026_v48 = vmul.f32 %v2138_v46, %v1024_v47 }
0x14bd   :  { %1028 = vrot.lane.b32.xlu1 %v1026_v48, %s2254_s6 }
0x152f   :  { %v1029_v50 = vpop.permute.xlu1 %1028 }
0x1530   :  { %v1031_v16 = vadd.f32 %v1029_v50, %v1021_v49 }
0x1532   :  { %2139 = vtanh.f32 %v1031_v16 }
0x153c   :  { %v2140_v56 = vpop.eup %2139 }
0x153d   :  { %1034 = vrot.lane.b32.xlu0 %v2140_v56, %s2254_s6 }
0x15af   :  { %v1035_v4 = vpop.permute.xlu0 %1034 }
0x15b0   :  { %v1037_v5 = vmul.f32 %v2138_v46, %v1035_v4 }
0x15b2   :  { %1050 = vrot.lane.b32.xlu1 %v1037_v5, %s2255_s4 }
0x1624   :  { %v1051_v6 = vpop.permute.xlu1 %1050 }
0x1625   :  { %1915 = vmatmul.mubr.msk.f32.vlgmr.msra.gmra.mrb[14].mxu0 %vm83_vm1, %v1051_v6 }
0x1626   :  { %2042 = vmatpush3.bf16.msra.mxu0 %v2035_v59  ;;  %1936 = vmatprep.mubr.msk.f32.mxu0 %vm2252_vm0, %v2253_v1 }
0x1627   :  { %2043 = vmatprep.subr.bf16.mxu0 %v2251_v0 }
0x162a   :  { %2045 = vmatpush3.bf16.msra.mxu0 %v2038_v63 }
0x162b   :  { %2052 = vmatprep.subr.bf16.mxu0 %v2251_v0 }
0x16f8   :  { %v1120_v10 = vpop.f32.mrb[14].mxu0 }
0x16f9   :  { %v1121_v11 = vadd.f32 %v1702_v8, %v1120_v10  ;;  %v1916_v12 = vpop.f32.mrb[15].mxu0  ;;  %v1713_v8 = vld [vmem:[%s2612_s1 + $0x18] sm:$0xff] }
0x16fb   :  { %1128 = vst [vmem:[#allocation3] ss:$16 sps:$4 sm:$0x33] %v1121_v11   ;;  %1129 = vst [vmem:[#allocation3 + $0x6] ss:$16 sps:$4 sm:$0xcc] %v1121_v11  }
0x1702   :  { %v1136_v14 = vld [vmem:[#allocation3] sm:$0xff]  ;;  %v1241_v29 = vld [vmem:[#allocation3 + $0x8] sm:$0xff]  ;;  %v1352_v46 = vld [vmem:[#allocation3 + $0x10] sm:$0xff] }
0x1703   :  { %v1207_v13 = vadd.f32 %v1203_v7, %v1136_v14 }
0x1705   :  { %2141 = vtanh.f32 %v1207_v13  ;;  %v1704_v62 = vmul.f32 -1.442695, %v1207_v13 }
0x1707   :  { %2143 = vpow2.f32 %v1704_v62  ;;  %v1707_v62 = vld [vmem:[%s2612_s1 + $0x8] sm:$0xff] }
0x170f   :  { %v2142_v15 = vpop.eup %2141 }
0x1710   :  { %1217 = vrot.lane.b32.xlu0 %v2142_v15, %s2254_s6 }
0x1711   :  { %v2144_v17 = vpop.eup %2143 }
0x1712   :  { %v1211_v18 = vadd.f32 1.0, %v2144_v17  ;;  %v1710_v17 = vld [vmem:[%s2612_s1 + $0x10] sm:$0xff] }
0x1714   :  { %2145 = vrcp.f32 %v1211_v18 }
0x171e   :  { %v2146_v19 = vpop.eup %2145 }
0x171f   :  { %v1215_v22 = vmul.f32 0.0, %v2146_v19 }
0x1782   :  { %v1218_v20 = vpop.permute.xlu0 %1217 }
0x1783   :  { %v1220_v21 = vmul.f32 %v2146_v19, %v1218_v20 }
0x1785   :  { %1222 = vrot.lane.b32.xlu1 %v1220_v21, %s2254_s6 }
0x17f7   :  { %v1223_v23 = vpop.permute.xlu1 %1222 }
0x17f8   :  { %v1225_v24 = vadd.f32 %v1223_v23, %v1215_v22  ;;  %v1575_v22 = vld [vmem:[#allocation7] sm:$0xff]  ;;  %v1576_v23 = vld [vmem:[#allocation7 + $0x8] sm:$0xff] }
0x17fa   :  { %2147 = vtanh.f32 %v1225_v24 }
0x1804   :  { %v2148_v25 = vpop.eup %2147 }
0x1805   :  { %1228 = vrot.lane.b32.xlu0 %v2148_v25, %s2254_s6  ;;  %v2059_v25 = vpack.c.bf16 %v1576_v23, %v1575_v22 }
0x1877   :  { %v1229_v26 = vpop.permute.xlu0 %1228 }
0x1878   :  { %v2552_v27 = vmul.f32 %v2146_v19, %v1229_v26  ;;  %v1578_v26 = vld [vmem:[#allocation7 + $0x18] sm:$0xff] }
0x187a   :  { %1243 = vrot.lane.b32.xlu1 %v2552_v27, %s2255_s4 }
0x18ec   :  { %v1244_v28 = vpop.permute.xlu1 %1243 }
0x18ed   :  { %1937 = vmatmul.mubr.msk.f32.vlgmr.msra.gmra.mrb[16].mxu0 %vm83_vm1, %v1244_v28 }
0x18ee   :  { %2054 = vmatpush3.bf16.msra.mxu0 %v2035_v59  ;;  %1958 = vmatprep.mubr.msk.f32.mxu0 %vm2252_vm0, %v2253_v1 }
0x18ef   :  { %2055 = vmatprep.subr.bf16.mxu0 %v2251_v0 }
0x18f2   :  { %2057 = vmatpush3.bf16.msra.mxu0 %v2038_v63  ;;  %v1463_v63 = vld [vmem:[#allocation3 + $0x18] sm:$0xff] }
0x19c0   :  { %v1313_v30 = vpop.f32.mrb[16].mxu0 }
0x19c1   :  { %v1317_v31 = vadd.f32 %v1313_v30, %v1241_v29  ;;  %v1938_v32 = vpop.f32.mrb[17].mxu0 }
0x19c3   :  { %2149 = vtanh.f32 %v1317_v31  ;;  %v1706_v3 = vmul.f32 -1.442695, %v1317_v31 }
0x19c5   :  { %2151 = vpow2.f32 %v1706_v3 }
0x19cd   :  { %v2150_v33 = vpop.eup %2149 }
0x19ce   :  { %1327 = vrot.lane.b32.xlu0 %v2150_v33, %s2254_s6 }
0x19cf   :  { %v2152_v34 = vpop.eup %2151 }
0x19d0   :  { %v1321_v35 = vadd.f32 1.0, %v2152_v34 }
0x19d2   :  { %2153 = vrcp.f32 %v1321_v35 }
0x19dc   :  { %v2154_v36 = vpop.eup %2153 }
0x19dd   :  { %v1325_v39 = vmul.f32 %v2154_v36, %v1225_v24  ;;  %v1577_v24 = vld [vmem:[#allocation7 + $0x10] sm:$0xff] }
0x19de   :  { %v2062_v28 = vpack.c.bf16 %v1578_v26, %v1577_v24 }
0x1a40   :  { %v1328_v37 = vpop.permute.xlu0 %1327 }
0x1a41   :  { %v1330_v38 = vmul.f32 %v2154_v36, %v1328_v37 }
0x1a43   :  { %1332 = vrot.lane.b32.xlu1 %v1330_v38, %s2254_s6 }
0x1ab5   :  { %v1333_v40 = vpop.permute.xlu1 %1332 }
0x1ab6   :  { %v1335_v41 = vadd.f32 %v1333_v40, %v1325_v39 }
0x1ab8   :  { %2155 = vtanh.f32 %v1335_v41 }
0x1ac2   :  { %v2156_v42 = vpop.eup %2155 }
0x1ac3   :  { %1338 = vrot.lane.b32.xlu0 %v2156_v42, %s2254_s6 }
0x1b35   :  { %v1339_v43 = vpop.permute.xlu0 %1338 }
0x1b36   :  { %v2563_v44 = vmul.f32 %v2154_v36, %v1339_v43 }
0x1b38   :  { %1354 = vrot.lane.b32.xlu1 %v2563_v44, %s2255_s4 }
0x1baa   :  { %v1355_v45 = vpop.permute.xlu1 %1354 }
0x1bab   :  { %1948 = vmatmul.mubr.msk.f32.vlgmr.msra.gmra.mrb[12].mxu1 %vm83_vm1, %v1355_v45 }
0x1bac   :  { %1969 = vmatprep.mubr.msk.f32.mxu1 %vm2252_vm0, %v2253_v1  ;;  %2060 = vmatpush3.bf16.msra.mxu1 %v2059_v25 }
0x1bad   :  { %2061 = vmatprep.subr.bf16.mxu1 %v2251_v0 }
0x1bb0   :  { %2063 = vmatpush3.bf16.msra.mxu1 %v2062_v28 }
0x1c7e   :  { %v1424_v47 = vpop.f32.mrb[12].mxu1 }
0x1c7f   :  { %v1428_v48 = vadd.f32 %v1424_v47, %v1352_v46  ;;  %v1949_v49 = vpop.f32.mrb[13].mxu1 }
0x1c81   :  { %2157 = vtanh.f32 %v1428_v48  ;;  %v1709_v16 = vmul.f32 -1.442695, %v1428_v48 }
0x1c83   :  { %2159 = vpow2.f32 %v1709_v16 }
0x1c8b   :  { %v2158_v50 = vpop.eup %2157 }
0x1c8c   :  { %1438 = vrot.lane.b32.xlu0 %v2158_v50, %s2254_s6 }
0x1c8d   :  { %v2160_v2 = vpop.eup %2159 }
0x1c8e   :  { %v1432_v51 = vadd.f32 1.0, %v2160_v2 }
0x1c90   :  { %2161 = vrcp.f32 %v1432_v51 }
0x1c9a   :  { %v2162_v52 = vpop.eup %2161 }
0x1c9b   :  { %v1436_v55 = vmul.f32 %v2162_v52, %v1335_v41 }
0x1cfe   :  { %v1439_v53 = vpop.permute.xlu0 %1438 }
0x1cff   :  { %v1441_v54 = vmul.f32 %v2162_v52, %v1439_v53 }
0x1d01   :  { %1443 = vrot.lane.b32.xlu1 %v1441_v54, %s2254_s6 }
0x1d73   :  { %v1444_v1 = vpop.permute.xlu1 %1443 }
0x1d74   :  { %v1446_v56 = vadd.f32 %v1444_v1, %v1436_v55 }
0x1d76   :  { %2163 = vtanh.f32 %v1446_v56 }
0x1d80   :  { %v2164_v57 = vpop.eup %2163 }
0x1d81   :  { %1449 = vrot.lane.b32.xlu0 %v2164_v57, %s2254_s6 }
0x1df3   :  { %v1450_v58 = vpop.permute.xlu0 %1449 }
0x1df4   :  { %v1452_v59 = vmul.f32 %v2162_v52, %v1450_v58 }
0x1df6   :  { %1465 = vrot.lane.b32.xlu1 %v1452_v59, %s2255_s4 }
0x1e68   :  { %v1466_v60 = vpop.permute.xlu1 %1465 }
0x1e69   :  { %1959 = vmatmul.mubr.msk.f32.vlgmr.msra.gmra.mrb[18].mxu0 %vm83_vm1, %v1466_v60 }
0x1f3c   :  { %v1535_v4 = vpop.f32.mrb[18].mxu0 }
0x1f3d   :  { %v1539_v5 = vadd.f32 %v1535_v4, %v1463_v63  ;;  %v1960_v6 = vpop.f32.mrb[19].mxu0 }
0x1f3f   :  { %2165 = vtanh.f32 %v1539_v5  ;;  %v1712_v10 = vmul.f32 -1.442695, %v1539_v5 }
0x1f41   :  { %2167 = vpow2.f32 %v1712_v10 }
0x1f49   :  { %v2166_v7 = vpop.eup %2165 }
0x1f4a   :  { %1549 = vrot.lane.b32.xlu0 %v2166_v7, %s2254_s6 }
0x1f4b   :  { %v2168_v11 = vpop.eup %2167 }
0x1f4c   :  { %v1543_v12 = vadd.f32 1.0, %v2168_v11 }
0x1f4e   :  { %1235 = vperm.xlu0 %2075, %v1232_v9   ;;  %2169 = vrcp.f32 %v1543_v12 }
0x1f52   :  { %1568 = vperm.xlu0 %2075, %v1713_v8  }
0x1f58   :  { %v2170_v14 = vpop.eup %2169 }
0x1f59   :  { %v1547_v18 = vmul.f32 %v2170_v14, %v1446_v56 }
0x1fbc   :  { %v1550_v13 = vpop.permute.xlu0 %1549 }
0x1fbd   :  { %v1552_v15 = vmul.f32 %v2170_v14, %v1550_v13 }
0x1fbf   :  { %1554 = vrot.lane.b32.xlu1 %v1552_v15, %s2254_s6 }
0x1fc3   :  { %1346 = vperm.xlu1 %2076, %v1707_v62  }
0x1fc7   :  { %1457 = vperm.xlu1 %2076, %v1710_v17  }
0x1fcd   :  { %v1236_v30 = vpop.permute.xlu0 %1235 }
0x1fce   :  { %v1238_v33 = vmul.f32 %v1236_v30, %v2552_v27  ;;  %v1714_v27 = vld [vmem:[%s2620_s9] ss:$0 sm:$0xff] }
0x1fd1   :  { %v1569_v37 = vpop.permute.xlu0 %1568 }
0x2031   :  { %v1555_v19 = vpop.permute.xlu1 %1554 }
0x2032   :  { %v1557_v20 = vadd.f32 %v1555_v19, %v1547_v18 }
0x2034   :  { %2171 = vtanh.f32 %v1557_v20 }
0x203e   :  { %v2172_v21 = vpop.eup %2171 }
0x203f   :  { %1560 = vrot.lane.b32.xlu1 %v2172_v21, %s2254_s6 }
0x2042   :  { %v1347_v29 = vpop.permute.xlu1 %1346 }
0x2043   :  { %v1349_v32 = vmul.f32 %v1347_v29, %v2563_v44 }
0x2045   :  { %v1350_v35 = vadd.f32 %v1349_v32, %v1238_v33 }
0x2046   :  { %v1458_v31 = vpop.permute.xlu1 %1457 }
0x2047   :  { %v1460_v3 = vmul.f32 %v1458_v31, %v1452_v59 }
0x2049   :  { %v1461_v38 = vadd.f32 %v1460_v3, %v1350_v35 }
0x20b1   :  { %v1561_v34 = vpop.permute.xlu1 %1560 }
0x20b2   :  { %v1563_v36 = vmul.f32 %v2170_v14, %v1561_v34 }
0x20b4   :  { %v1571_v39 = vmul.f32 %v1569_v37, %v1563_v36 }
0x20b6   :  { %v1572_v40 = vadd.f32 %v1571_v39, %v1461_v38 }
0x20b8   :  { %v1573_v41 = vmul.f32 0.25, %v1572_v40 }
0x20ba   :  { %2173 = vtanh.f32 %v1573_v41 }
0x20c4   :  { %v2174_v42 = vpop.eup %2173 }
0x20c5   :  { %1587 = vrot.lane.b32.xlu0 %v2174_v42, %s2255_s4 }
0x2137   :  { %v1588_v0 = vpop.permute.xlu0 %1587 }
0x2138   :  { %1970 = vmatmul.mubr.msk.f32.vlgmr.msra.gmra.mrb[14].mxu1 %vm83_vm1, %v1588_v0 }
0x220b   :  { %v1657_v43 = vpop.f32.mrb[14].mxu1 }
0x220c   :  { %v1658_v44 = vadd.f32 %v1714_v27, %v1657_v43  ;;  %v1971_v45 = vpop.f32.mrb[15].mxu1 }
0x220e   :  { %1661 = vst.msk [vmem:[#allocation9] sm:$0xff] %vm83_vm1, %v1658_v44 }
0x220f   :  { %2230 = shalt.err (!%p2227_p6)
}
0x2210   :  { %s2231_s24 = scalar_lea.hbm %s2621_s10, 128 }
0x2211   :  { %p2232_p7 = scmp.ne.s32.totalorder %s2621_s10, %s2231_s24  ;;  %p2235_p8 = scmp.lt.u32.totalorder %s2231_s24, %s2621_s10 }
0x2213   :  { %p2237_p9 = pnand %p2235_p8, %p2232_p7 }
0x2215   :  { %2240 = shalt.err (!%p2237_p9)
}
0x2216   :  { %1671 = dma.vmem_to_hbm [thread:$0]  %s1669_s21, 128, %s2621_s10, [#allocation6]  }
0x2217   :  { %2245 = dma.done.wait [#allocation6], 128  }
0x2218   :  { %2246 = vsyncadd [#allocation6], 4294967168 }
0x2219   :  { %1675 = vsyncpa [#allocation5], 1 }
0x221a   :  { %1676 = vsyncpa [#allocation8], 1 }
0x221b   :  { %1677 = vsyncpa [#allocation6], 1 }

</bundles_post_ra>
